<compile_context>
chip_gen: v7x
topology: tpu7x:2x2x1
jax: 0.10.0
libtpu: 0.0.40
codegen_flags: <defaults>
</compile_context>

<pallas_src>
from functools import partial

import jax
import jax.numpy as jnp
from jax.experimental import pallas as pl
from jax.experimental.pallas import tpu as pltpu


def _pooler_self_attention_kernel(
    x_ref, wq_ref, bq_ref, wk_ref, bk_ref, wv_ref, bv_ref, wo_ref, bo_ref,  # inputs
    o_ref,                                                                   # output
    kh_ref, vh_ref, qh_ref, ctx_ref,                                         # VMEM scratch
    *, num_heads, head_dim, q_tile, kv_tile,
):
    H, D = num_heads, head_dim
    E = H * D
    S = x_ref.shape[1]
    TQ, TK = q_tile, kv_tile
    num_kv = S // TK
    qt = pl.program_id(1)

    # ---- K/V projection: once per batch element (first q-tile step only).
    # Downcast to bf16 right after the bias add and stage head-major into the
    # persistent scratch (no (S,3E) f32 intermediate, no recompute per q tile).
    @pl.when(qt == 0)
    def _project_kv():
        x_full = x_ref[0]                                                  # (S, E) bf16
        k = jnp.dot(x_full, wk_ref[...], preferred_element_type=jnp.float32)
        k = (k + bk_ref[...]).astype(jnp.bfloat16)                         # (S, E)
        for h in range(H):
            kh_ref[h] = k[:, h * D:(h + 1) * D]
        v = jnp.dot(x_full, wv_ref[...], preferred_element_type=jnp.float32)
        v = (v + bv_ref[...]).astype(jnp.bfloat16)                         # (S, E)
        for h in range(H):
            vh_ref[h] = v[:, h * D:(h + 1) * D]

    # ---- Q projection for this tile only; 1/sqrt(D) is pre-folded into wq/bq.
    if TQ == S:                                                            # static branch
        x_tile = x_ref[0]                                                  # (S, E) bf16
    else:
        q_start = pl.multiple_of(qt * TQ, TQ)
        x_tile = x_ref[0, pl.ds(q_start, TQ), :]                           # (TQ, E) bf16
    q = jnp.dot(x_tile, wq_ref[...], preferred_element_type=jnp.float32)
    q = (q + bq_ref[...]).astype(jnp.bfloat16)                             # (TQ, E)
    for h in range(H):
        qh_ref[h] = q[:, h * D:(h + 1) * D]
    qh = qh_ref[...]                                                       # (H, TQ, D) bf16
    # TODO(synk): try an in-vreg reshape/pltpu.einshape relayout instead of the
    # qh staging stores if profiling shows the vector-store slot as the limiter.

    # ---- flash-style online softmax over KV tiles (running m/l/acc in f32).
    def kv_step(kt, vt, carry):
        m_prev, l_prev, acc_prev = carry
        s = jnp.einsum('hqd,hkd->hqk', qh, kt,
                       preferred_element_type=jnp.float32)                 # (H, TQ, TK)
        m_new = jnp.maximum(m_prev, jnp.max(s, axis=-1, keepdims=True))
        alpha = jnp.exp(m_prev - m_new)
        p = jnp.exp(s - m_new)
        l_new = alpha * l_prev + jnp.sum(p, axis=-1, keepdims=True)
        acc_new = alpha * acc_prev + jnp.einsum(
            'hqk,hkd->hqd', p.astype(jnp.bfloat16), vt,
            preferred_element_type=jnp.float32)
        return m_new, l_new, acc_new

    m0 = jnp.full((H, TQ, 1), -jnp.inf, dtype=jnp.float32)
    l0 = jnp.zeros((H, TQ, 1), dtype=jnp.float32)
    acc0 = jnp.zeros((H, TQ, D), dtype=jnp.float32)

    if num_kv == 1:                                                        # static branch
        _, l_f, acc_f = kv_step(kh_ref[...], vh_ref[...], (m0, l0, acc0))
    else:
        def body(t, carry):
            k_start = pl.multiple_of(t * TK, TK)
            return kv_step(kh_ref[:, pl.ds(k_start, TK), :],
                           vh_ref[:, pl.ds(k_start, TK), :], carry)
        _, l_f, acc_f = jax.lax.fori_loop(0, num_kv, body, (m0, l0, acc0))

    # Softmax normalization; approx reciprocal rides the (otherwise idle) EUP slot.
    ctx = acc_f * pl.reciprocal(l_f, approx=True)                          # (H, TQ, D) f32

    # ---- merge heads (contiguous along E) and apply the output projection.
    for h in range(H):
        ctx_ref[:, h * D:(h + 1) * D] = ctx[h].astype(jnp.bfloat16)
    out = jnp.dot(ctx_ref[...], wo_ref[...],
                  preferred_element_type=jnp.float32) + bo_ref[...]
    o_ref[0] = out.astype(o_ref.dtype)


def prepare_pooler_attention_params(params, num_heads):
    """One-time parameter prep (hoisted out of the per-forward path).

    Linear weights are stored [in, out] (= torch Linear W^T) so the kernel
    computes y = x @ W + b. 1/sqrt(head_dim) is folded into the q projection.
    Weights are cast to bf16 (MXU-native); biases stay f32.
    """
    E = params["wq"].shape[0]
    D = E // num_heads
    scale = D ** (-0.5)
    return {
        "wq": (params["wq"] * scale).astype(jnp.bfloat16),
        "bq": (params["bq"] * scale).astype(jnp.float32),
        "wk": params["wk"].astype(jnp.bfloat16),
        "bk": params["bk"].astype(jnp.float32),
        "wv": params["wv"].astype(jnp.bfloat16),
        "bv": params["bv"].astype(jnp.float32),
        "wo": params["wo"].astype(jnp.bfloat16),
        "bo": params["bo"].astype(jnp.float32),
    }


def _estimate_vmem_bytes(S, E, H, D, TQ, TK):
    bf16b, f32b = 2, 4
    io = 2 * S * E * bf16b + 2 * TQ * E * f32b                 # x + out, double-buffered
    weights = 2 * (4 * E * E * bf16b + 4 * E * f32b)           # weights + biases, 2-buffered
    scratch = (2 * H * S * D + H * TQ * D + TQ * E) * bf16b    # kh, vh, qh, ctx
    live = (S * E * f32b                                       # K or V f32 before downcast
            + TQ * E * f32b                                    # Q f32 before downcast
            + 2 * H * TQ * TK * f32b                           # scores + probs
            + 2 * H * TQ * D * f32b)                           # acc + ctx f32
    return io + weights + scratch + live


def _pick_tiles(S, E, H, D, vmem_cap):
    """Largest (TQ, TK) dividing S whose estimated footprint fits ~85% of VMEM."""
    budget = int(0.85 * vmem_cap)
    # Bigger query tiles amortize per-step overhead on v5e/v6e (128 MiB VMEM);
    # keep TQ=128 on v7x (64 MiB per TensorCore).
    tq_cands = (512, 256, 128) if vmem_cap >= 96 * 1024 * 1024 else (128,)
    tq_cands = [t for t in tq_cands if t < S and S % t == 0] or [S]
    tk_cands = [t for t in (512, 256, 128) if t < S and S % t == 0] or [S]
    # TODO(synk): pad S to a multiple of 128 for large non-aligned sequences;
    # the fallback above degenerates to a single full-S tile.
    for tq in tq_cands:
        for tk in tk_cands:
            if _estimate_vmem_bytes(S, E, H, D, tq, tk) <= budget:
                return tq, tk, budget
    return tq_cands[-1], tk_cands[-1], budget


def vjepa2_pooler_self_attention(hidden_states, prepared, num_heads):
    """Forward of VJEPA2PoolerSelfAttention (eval mode: dropout=0, mask=None).

    hidden_states: [B, S, E]; `prepared` from prepare_pooler_attention_params.
    Returns attn_output [B, S, E] (attn_weights not returned: output_attentions=False).
    """
    B, S, E = hidden_states.shape
    H = num_heads
    D = E // H
    out_dtype = hidden_states.dtype

    try:
        vmem_cap = getattr(pltpu.get_tpu_info(), "vmem_capacity_bytes",
                           64 * 1024 * 1024)
    except Exception:  # pragma: no cover - conservative fallback
        vmem_cap = 64 * 1024 * 1024

    TQ, TK, budget = _pick_tiles(S, E, H, D, vmem_cap)
    num_q_tiles = S // TQ

    est = _estimate_vmem_bytes(S, E, H, D, TQ, TK)
    vmem_limit = max(32 * 1024 * 1024, min(int(1.5 * est), budget))

    # Half-sized x DMA: kernel consumes bf16 activations (softmax math stays f32).
    x_bf16 = hidden_states.astype(jnp.bfloat16)

    kernel = partial(_pooler_self_attention_kernel,
                     num_heads=H, head_dim=D, q_tile=TQ, kv_tile=TK)

    # Weight index maps are constant -> their blocks are only re-DMA'd once.
    # TODO(synk): pipeline_mode=pl.Buffered(1) on the weight specs would drop the
    # second (useless) pipeline buffer; left off pending jaxlib support check.
    const = lambda b, qt: (0, 0)
    in_specs = [
        pl.BlockSpec((1, S, E), lambda b, qt: (b, 0, 0)),   # x (full seq; constant over qt)
        pl.BlockSpec((E, E), const),                        # wq (scale folded, bf16)
        pl.BlockSpec((1, E), const),                        # bq (scale folded)
        pl.BlockSpec((E, E), const),                        # wk
        pl.BlockSpec((1, E), const),                        # bk
        pl.BlockSpec((E, E), const),                        # wv
        pl.BlockSpec((1, E), const),                        # bv
        pl.BlockSpec((E, E), const),                        # wo
        pl.BlockSpec((1, E), const),                        # bo
    ]
    out_specs = pl.BlockSpec((1, TQ, E), lambda b, qt: (b, qt, 0))

    scratch_shapes = [
        pltpu.VMEM((H, S, D), jnp.bfloat16),    # K head-major (persistent per batch)
        pltpu.VMEM((H, S, D), jnp.bfloat16),    # V head-major (persistent per batch)
        pltpu.VMEM((H, TQ, D), jnp.bfloat16),   # Q head-major (per q tile)
        pltpu.VMEM((TQ, E), jnp.bfloat16),      # merged context
    ]

    return pl.pallas_call(
        kernel,
        out_shape=jax.ShapeDtypeStruct((B, S, E), out_dtype),
        grid=(B, num_q_tiles),
        in_specs=in_specs,
        out_specs=out_specs,
        scratch_shapes=scratch_shapes,
        compiler_params=pltpu.CompilerParams(
            dimension_semantics=("parallel", "arbitrary"),
            vmem_limit_bytes=vmem_limit),
    )(x_bf16, prepared["wq"], prepared["bq"], prepared["wk"], prepared["bk"],
      prepared["wv"], prepared["bv"], prepared["wo"], prepared["bo"])


def _reference(hidden_states, params, num_heads):
    """Pure-JAX f32 reference mirroring the PyTorch forward exactly."""
    B, S, E = hidden_states.shape
    D = E // num_heads
    scale = D ** (-0.5)

    q = hidden_states @ params["wq"] + params["bq"]
    k = hidden_states @ params["wk"] + params["bk"]
    v = hidden_states @ params["wv"] + params["bv"]

    def split_heads(t):
        return t.reshape(B, S, num_heads, D).transpose(0, 2, 1, 3)   # (B, H, S, D)

    q, k, v = split_heads(q), split_heads(k), split_heads(v)
    attn_weights = (q @ k.transpose(0, 1, 3, 2)) * scale
    attn_weights = jax.nn.softmax(attn_weights.astype(jnp.float32), axis=-1)
    attn_output = attn_weights @ v                                   # (B, H, S, D)
    attn_output = attn_output.transpose(0, 2, 1, 3).reshape(B, S, E)
    return attn_output @ params["wo"] + params["bo"]


if __name__ == "__main__":
    # Small config consistent with the module: hidden_size=64, num_attention_heads=4.
    B, S, E, H = 2, 16, 64, 4

    key = jax.random.PRNGKey(0)
    keys = jax.random.split(key, 9)

    # Deterministic synthetic parameters. Weights stored as [in, out] (= torch W^T).
    params = {
        "wq": jax.random.normal(keys[0], (E, E), jnp.float32) * 0.05,
        "bq": jax.random.normal(keys[1], (1, E), jnp.float32) * 0.05,
        "wk": jax.random.normal(keys[2], (E, E), jnp.float32) * 0.05,
        "bk": jax.random.normal(keys[3], (1, E), jnp.float32) * 0.05,
        "wv": jax.random.normal(keys[4], (E, E), jnp.float32) * 0.05,
        "bv": jax.random.normal(keys[5], (1, E), jnp.float32) * 0.05,
        "wo": jax.random.normal(keys[6], (E, E), jnp.float32) * 0.05,
        "bo": jax.random.normal(keys[7], (1, E), jnp.float32) * 0.05,
    }
    hidden_states = jax.random.normal(keys[8], (B, S, E), jnp.float32)

    prepared = prepare_pooler_attention_params(params, num_heads=H)
    out = vjepa2_pooler_self_attention(hidden_states, prepared, num_heads=H)
    out = jax.block_until_ready(out)

    ref = _reference(hidden_states, params, num_heads=H)
    assert out.shape == (B, S, E)
    max_err = float(jnp.max(jnp.abs(out - ref)))
    # bf16 MXU operands + approx-reciprocal softmax denominator (f32 accumulation /
    # f32 softmax math) -> loosened tolerance vs. the exact f32 reference.
    assert jnp.allclose(out, ref, atol=2e-2, rtol=2e-2), \
        f"mismatch vs reference (max |err| = {max_err})"

    # TODO(synk): optional attention_mask (multiplicative, post-softmax) and the
    # output_attentions / attn_weights return path are not wired into the kernel
    # (PyTorch defaults are None / False).
    print("KERNEL_OK")
</pallas_src>

<mosaic_0001>
module attributes {stable_mosaic.version = 11 : i64} {
  func.func @_pooler_self_attention_kernel(%arg0: i32, %arg1: i32, %arg2: memref<1x16x64xbf16, #tpu.memory_space<vmem>>, %arg3: memref<64x64xbf16, #tpu.memory_space<vmem>>, %arg4: memref<1x64xf32, #tpu.memory_space<vmem>>, %arg5: memref<64x64xbf16, #tpu.memory_space<vmem>>, %arg6: memref<1x64xf32, #tpu.memory_space<vmem>>, %arg7: memref<64x64xbf16, #tpu.memory_space<vmem>>, %arg8: memref<1x64xf32, #tpu.memory_space<vmem>>, %arg9: memref<64x64xbf16, #tpu.memory_space<vmem>>, %arg10: memref<1x64xf32, #tpu.memory_space<vmem>>, %arg11: memref<1x16x64xf32, #tpu.memory_space<vmem>>, %arg12: memref<4x16x16xbf16, #tpu.memory_space<vmem>>, %arg13: memref<4x16x16xbf16, #tpu.memory_space<vmem>>, %arg14: memref<4x16x16xbf16, #tpu.memory_space<vmem>>, %arg15: memref<16x64xbf16, #tpu.memory_space<vmem>>) attributes {dimension_semantics = [#tpu.dimension_semantics<parallel>, #tpu.dimension_semantics<arbitrary>], iteration_bounds = array<i64: 2, 1>, scalar_prefetch = 0 : i64, scratch_operands = 4 : i64, tpu.core_type = #tpu.core_type<tc>, window_params = [{transform_indices = @transform_0, window_bounds = array<i64: 1, 16, 64>}, {pipeline_mode = #tpu.pipeline_mode<synchronous>, transform_indices = @transform_1, window_bounds = array<i64: 64, 64>}, {pipeline_mode = #tpu.pipeline_mode<synchronous>, transform_indices = @transform_2, window_bounds = array<i64: 1, 64>}, {pipeline_mode = #tpu.pipeline_mode<synchronous>, transform_indices = @transform_3, window_bounds = array<i64: 64, 64>}, {pipeline_mode = #tpu.pipeline_mode<synchronous>, transform_indices = @transform_4, window_bounds = array<i64: 1, 64>}, {pipeline_mode = #tpu.pipeline_mode<synchronous>, transform_indices = @transform_5, window_bounds = array<i64: 64, 64>}, {pipeline_mode = #tpu.pipeline_mode<synchronous>, transform_indices = @transform_6, window_bounds = array<i64: 1, 64>}, {pipeline_mode = #tpu.pipeline_mode<synchronous>, transform_indices = @transform_7, window_bounds = array<i64: 64, 64>}, {pipeline_mode = #tpu.pipeline_mode<synchronous>, transform_indices = @transform_8, window_bounds = array<i64: 1, 64>}, {transform_indices = @transform_9, window_bounds = array<i64: 1, 16, 64>}]} {
    %c0_i32 = arith.constant 0 : i32
    %0 = arith.cmpi eq, %arg1, %c0_i32 : i32
    %1 = arith.extui %0 : i1 to i32
    %c0_i32_0 = arith.constant 0 : i32
    %2 = arith.cmpi ne, %1, %c0_i32_0 : i32
    scf.if %2 {
      %c0_47 = arith.constant 0 : index
      %c0_48 = arith.constant 0 : index
      %c0_49 = arith.constant 0 : index
      %79 = vector.load %arg2[%c0_47, %c0_48, %c0_49] : memref<1x16x64xbf16, #tpu.memory_space<vmem>>, vector<1x16x64xbf16>
      %80 = vector.shape_cast %79 : vector<1x16x64xbf16> to vector<16x64xbf16>
      %c0_50 = arith.constant 0 : index
      %c0_51 = arith.constant 0 : index
      %81 = vector.load %arg5[%c0_50, %c0_51] : memref<64x64xbf16, #tpu.memory_space<vmem>>, vector<64x64xbf16>
      %cst_52 = arith.constant dense<0.000000e+00> : vector<16x64xf32>
      %82 = tpu.matmul %80, %81, %cst_52 {dimension_numbers = #tpu.dot_dimension_numbers<[1], [0], [0], [1], [0, 0, 1, 1], [], []>} : vector<16x64xbf16>, vector<64x64xbf16>, vector<16x64xf32> -> vector<16x64xf32>
      %c0_53 = arith.constant 0 : index
      %c0_54 = arith.constant 0 : index
      %83 = vector.load %arg6[%c0_53, %c0_54] : memref<1x64xf32, #tpu.memory_space<vmem>>, vector<1x64xf32>
      %84 = vector.broadcast %83 : vector<1x64xf32> to vector<16x64xf32>
      %85 = arith.addf %82, %84 : vector<16x64xf32>
      %86 = arith.truncf %85 : vector<16x64xf32> to vector<16x64xbf16>
      %87 = vector.extract_strided_slice %86 {offsets = [0, 0], sizes = [16, 16], strides = [1, 1]} : vector<16x64xbf16> to vector<16x16xbf16>
      %c0_55 = arith.constant 0 : index
      %c0_56 = arith.constant 0 : index
      %c0_57 = arith.constant 0 : index
      %88 = vector.load %arg12[%c0_55, %c0_56, %c0_57] : memref<4x16x16xbf16, #tpu.memory_space<vmem>>, vector<1x16x16xbf16>
      %89 = vector.shape_cast %88 : vector<1x16x16xbf16> to vector<16x16xbf16>
      %90 = vector.shape_cast %87 : vector<16x16xbf16> to vector<1x16x16xbf16>
      tpu.vector_store %arg12[%c0_55, %c0_56, %c0_57], %90 {strides = array<i32>} : memref<4x16x16xbf16, #tpu.memory_space<vmem>>, vector<1x16x16xbf16>,
      %91 = vector.extract_strided_slice %86 {offsets = [0, 16], sizes = [16, 16], strides = [1, 1]} : vector<16x64xbf16> to vector<16x16xbf16>
      %c1_58 = arith.constant 1 : index
      %c0_59 = arith.constant 0 : index
      %c0_60 = arith.constant 0 : index
      %92 = vector.load %arg12[%c1_58, %c0_59, %c0_60] : memref<4x16x16xbf16, #tpu.memory_space<vmem>>, vector<1x16x16xbf16>
      %93 = vector.shape_cast %92 : vector<1x16x16xbf16> to vector<16x16xbf16>
      %94 = vector.shape_cast %91 : vector<16x16xbf16> to vector<1x16x16xbf16>
      tpu.vector_store %arg12[%c1_58, %c0_59, %c0_60], %94 {strides = array<i32>} : memref<4x16x16xbf16, #tpu.memory_space<vmem>>, vector<1x16x16xbf16>,
      %95 = vector.extract_strided_slice %86 {offsets = [0, 32], sizes = [16, 16], strides = [1, 1]} : vector<16x64xbf16> to vector<16x16xbf16>
      %c2_61 = arith.constant 2 : index
      %c0_62 = arith.constant 0 : index
      %c0_63 = arith.constant 0 : index
      %96 = vector.load %arg12[%c2_61, %c0_62, %c0_63] : memref<4x16x16xbf16, #tpu.memory_space<vmem>>, vector<1x16x16xbf16>
      %97 = vector.shape_cast %96 : vector<1x16x16xbf16> to vector<16x16xbf16>
      %98 = vector.shape_cast %95 : vector<16x16xbf16> to vector<1x16x16xbf16>
      tpu.vector_store %arg12[%c2_61, %c0_62, %c0_63], %98 {strides = array<i32>} : memref<4x16x16xbf16, #tpu.memory_space<vmem>>, vector<1x16x16xbf16>,
      %99 = vector.extract_strided_slice %86 {offsets = [0, 48], sizes = [16, 16], strides = [1, 1]} : vector<16x64xbf16> to vector<16x16xbf16>
      %c3_64 = arith.constant 3 : index
      %c0_65 = arith.constant 0 : index
      %c0_66 = arith.constant 0 : index
      %100 = vector.load %arg12[%c3_64, %c0_65, %c0_66] : memref<4x16x16xbf16, #tpu.memory_space<vmem>>, vector<1x16x16xbf16>
      %101 = vector.shape_cast %100 : vector<1x16x16xbf16> to vector<16x16xbf16>
      %102 = vector.shape_cast %99 : vector<16x16xbf16> to vector<1x16x16xbf16>
      tpu.vector_store %arg12[%c3_64, %c0_65, %c0_66], %102 {strides = array<i32>} : memref<4x16x16xbf16, #tpu.memory_space<vmem>>, vector<1x16x16xbf16>,
      %c0_67 = arith.constant 0 : index
      %c0_68 = arith.constant 0 : index
      %103 = vector.load %arg7[%c0_67, %c0_68] : memref<64x64xbf16, #tpu.memory_space<vmem>>, vector<64x64xbf16>
      %cst_69 = arith.constant dense<0.000000e+00> : vector<16x64xf32>
      %104 = tpu.matmul %80, %103, %cst_69 {dimension_numbers = #tpu.dot_dimension_numbers<[1], [0], [0], [1], [0, 0, 1, 1], [], []>} : vector<16x64xbf16>, vector<64x64xbf16>, vector<16x64xf32> -> vector<16x64xf32>
      %c0_70 = arith.constant 0 : index
      %c0_71 = arith.constant 0 : index
      %105 = vector.load %arg8[%c0_70, %c0_71] : memref<1x64xf32, #tpu.memory_space<vmem>>, vector<1x64xf32>
      %106 = vector.broadcast %105 : vector<1x64xf32> to vector<16x64xf32>
      %107 = arith.addf %104, %106 : vector<16x64xf32>
      %108 = arith.truncf %107 : vector<16x64xf32> to vector<16x64xbf16>
      %109 = vector.extract_strided_slice %108 {offsets = [0, 0], sizes = [16, 16], strides = [1, 1]} : vector<16x64xbf16> to vector<16x16xbf16>
      %c0_72 = arith.constant 0 : index
      %c0_73 = arith.constant 0 : index
      %c0_74 = arith.constant 0 : index
      %110 = vector.load %arg13[%c0_72, %c0_73, %c0_74] : memref<4x16x16xbf16, #tpu.memory_space<vmem>>, vector<1x16x16xbf16>
      %111 = vector.shape_cast %110 : vector<1x16x16xbf16> to vector<16x16xbf16>
      %112 = vector.shape_cast %109 : vector<16x16xbf16> to vector<1x16x16xbf16>
      tpu.vector_store %arg13[%c0_72, %c0_73, %c0_74], %112 {strides = array<i32>} : memref<4x16x16xbf16, #tpu.memory_space<vmem>>, vector<1x16x16xbf16>,
      %113 = vector.extract_strided_slice %108 {offsets = [0, 16], sizes = [16, 16], strides = [1, 1]} : vector<16x64xbf16> to vector<16x16xbf16>
      %c1_75 = arith.constant 1 : index
      %c0_76 = arith.constant 0 : index
      %c0_77 = arith.constant 0 : index
      %114 = vector.load %arg13[%c1_75, %c0_76, %c0_77] : memref<4x16x16xbf16, #tpu.memory_space<vmem>>, vector<1x16x16xbf16>
      %115 = vector.shape_cast %114 : vector<1x16x16xbf16> to vector<16x16xbf16>
      %116 = vector.shape_cast %113 : vector<16x16xbf16> to vector<1x16x16xbf16>
      tpu.vector_store %arg13[%c1_75, %c0_76, %c0_77], %116 {strides = array<i32>} : memref<4x16x16xbf16, #tpu.memory_space<vmem>>, vector<1x16x16xbf16>,
      %117 = vector.extract_strided_slice %108 {offsets = [0, 32], sizes = [16, 16], strides = [1, 1]} : vector<16x64xbf16> to vector<16x16xbf16>
      %c2_78 = arith.constant 2 : index
      %c0_79 = arith.constant 0 : index
      %c0_80 = arith.constant 0 : index
      %118 = vector.load %arg13[%c2_78, %c0_79, %c0_80] : memref<4x16x16xbf16, #tpu.memory_space<vmem>>, vector<1x16x16xbf16>
      %119 = vector.shape_cast %118 : vector<1x16x16xbf16> to vector<16x16xbf16>
      %120 = vector.shape_cast %117 : vector<16x16xbf16> to vector<1x16x16xbf16>
      tpu.vector_store %arg13[%c2_78, %c0_79, %c0_80], %120 {strides = array<i32>} : memref<4x16x16xbf16, #tpu.memory_space<vmem>>, vector<1x16x16xbf16>,
      %121 = vector.extract_strided_slice %108 {offsets = [0, 48], sizes = [16, 16], strides = [1, 1]} : vector<16x64xbf16> to vector<16x16xbf16>
      %c3_81 = arith.constant 3 : index
      %c0_82 = arith.constant 0 : index
      %c0_83 = arith.constant 0 : index
      %122 = vector.load %arg13[%c3_81, %c0_82, %c0_83] : memref<4x16x16xbf16, #tpu.memory_space<vmem>>, vector<1x16x16xbf16>
      %123 = vector.shape_cast %122 : vector<1x16x16xbf16> to vector<16x16xbf16>
      %124 = vector.shape_cast %121 : vector<16x16xbf16> to vector<1x16x16xbf16>
      tpu.vector_store %arg13[%c3_81, %c0_82, %c0_83], %124 {strides = array<i32>} : memref<4x16x16xbf16, #tpu.memory_space<vmem>>, vector<1x16x16xbf16>,
    } else {
    }
    %c0 = arith.constant 0 : index
    %c0_1 = arith.constant 0 : index
    %c0_2 = arith.constant 0 : index
    %3 = vector.load %arg2[%c0, %c0_1, %c0_2] : memref<1x16x64xbf16, #tpu.memory_space<vmem>>, vector<1x16x64xbf16>
    %4 = vector.shape_cast %3 : vector<1x16x64xbf16> to vector<16x64xbf16>
    %c0_3 = arith.constant 0 : index
    %c0_4 = arith.constant 0 : index
    %5 = vector.load %arg3[%c0_3, %c0_4] : memref<64x64xbf16, #tpu.memory_space<vmem>>, vector<64x64xbf16>
    %cst = arith.constant dense<0.000000e+00> : vector<16x64xf32>
    %6 = tpu.matmul %4, %5, %cst {dimension_numbers = #tpu.dot_dimension_numbers<[1], [0], [0], [1], [0, 0, 1, 1], [], []>} : vector<16x64xbf16>, vector<64x64xbf16>, vector<16x64xf32> -> vector<16x64xf32>
    %c0_5 = arith.constant 0 : index
    %c0_6 = arith.constant 0 : index
    %7 = vector.load %arg4[%c0_5, %c0_6] : memref<1x64xf32, #tpu.memory_space<vmem>>, vector<1x64xf32>
    %8 = vector.broadcast %7 : vector<1x64xf32> to vector<16x64xf32>
    %9 = arith.addf %6, %8 : vector<16x64xf32>
    %10 = arith.truncf %9 : vector<16x64xf32> to vector<16x64xbf16>
    %11 = vector.extract_strided_slice %10 {offsets = [0, 0], sizes = [16, 16], strides = [1, 1]} : vector<16x64xbf16> to vector<16x16xbf16>
    %c0_7 = arith.constant 0 : index
    %c0_8 = arith.constant 0 : index
    %c0_9 = arith.constant 0 : index
    %12 = vector.load %arg14[%c0_7, %c0_8, %c0_9] : memref<4x16x16xbf16, #tpu.memory_space<vmem>>, vector<1x16x16xbf16>
    %13 = vector.shape_cast %12 : vector<1x16x16xbf16> to vector<16x16xbf16>
    %14 = vector.shape_cast %11 : vector<16x16xbf16> to vector<1x16x16xbf16>
    tpu.vector_store %arg14[%c0_7, %c0_8, %c0_9], %14 {strides = array<i32>} : memref<4x16x16xbf16, #tpu.memory_space<vmem>>, vector<1x16x16xbf16>,
    %15 = vector.extract_strided_slice %10 {offsets = [0, 16], sizes = [16, 16], strides = [1, 1]} : vector<16x64xbf16> to vector<16x16xbf16>
    %c1 = arith.constant 1 : index
    %c0_10 = arith.constant 0 : index
    %c0_11 = arith.constant 0 : index
    %16 = vector.load %arg14[%c1, %c0_10, %c0_11] : memref<4x16x16xbf16, #tpu.memory_space<vmem>>, vector<1x16x16xbf16>
    %17 = vector.shape_cast %16 : vector<1x16x16xbf16> to vector<16x16xbf16>
    %18 = vector.shape_cast %15 : vector<16x16xbf16> to vector<1x16x16xbf16>
    tpu.vector_store %arg14[%c1, %c0_10, %c0_11], %18 {strides = array<i32>} : memref<4x16x16xbf16, #tpu.memory_space<vmem>>, vector<1x16x16xbf16>,
    %19 = vector.extract_strided_slice %10 {offsets = [0, 32], sizes = [16, 16], strides = [1, 1]} : vector<16x64xbf16> to vector<16x16xbf16>
    %c2 = arith.constant 2 : index
    %c0_12 = arith.constant 0 : index
    %c0_13 = arith.constant 0 : index
    %20 = vector.load %arg14[%c2, %c0_12, %c0_13] : memref<4x16x16xbf16, #tpu.memory_space<vmem>>, vector<1x16x16xbf16>
    %21 = vector.shape_cast %20 : vector<1x16x16xbf16> to vector<16x16xbf16>
    %22 = vector.shape_cast %19 : vector<16x16xbf16> to vector<1x16x16xbf16>
    tpu.vector_store %arg14[%c2, %c0_12, %c0_13], %22 {strides = array<i32>} : memref<4x16x16xbf16, #tpu.memory_space<vmem>>, vector<1x16x16xbf16>,
    %23 = vector.extract_strided_slice %10 {offsets = [0, 48], sizes = [16, 16], strides = [1, 1]} : vector<16x64xbf16> to vector<16x16xbf16>
    %c3 = arith.constant 3 : index
    %c0_14 = arith.constant 0 : index
    %c0_15 = arith.constant 0 : index
    %24 = vector.load %arg14[%c3, %c0_14, %c0_15] : memref<4x16x16xbf16, #tpu.memory_space<vmem>>, vector<1x16x16xbf16>
    %25 = vector.shape_cast %24 : vector<1x16x16xbf16> to vector<16x16xbf16>
    %26 = vector.shape_cast %23 : vector<16x16xbf16> to vector<1x16x16xbf16>
    tpu.vector_store %arg14[%c3, %c0_14, %c0_15], %26 {strides = array<i32>} : memref<4x16x16xbf16, #tpu.memory_space<vmem>>, vector<1x16x16xbf16>,
    %c0_16 = arith.constant 0 : index
    %c0_17 = arith.constant 0 : index
    %c0_18 = arith.constant 0 : index
    %27 = vector.load %arg14[%c0_16, %c0_17, %c0_18] : memref<4x16x16xbf16, #tpu.memory_space<vmem>>, vector<4x16x16xbf16>
    %cst_19 = arith.constant 0xFF800000 : f32
    %28 = vector.broadcast %cst_19 : f32 to vector<4x16x1xf32>
    %cst_20 = arith.constant 0.000000e+00 : f32
    %29 = vector.broadcast %cst_20 : f32 to vector<4x16x1xf32>
    %cst_21 = arith.constant 0.000000e+00 : f32
    %30 = vector.broadcast %cst_21 : f32 to vector<4x16x16xf32>
    %c0_22 = arith.constant 0 : index
    %c0_23 = arith.constant 0 : index
    %c0_24 = arith.constant 0 : index
    %31 = vector.load %arg12[%c0_22, %c0_23, %c0_24] : memref<4x16x16xbf16, #tpu.memory_space<vmem>>, vector<4x16x16xbf16>
    %c0_25 = arith.constant 0 : index
    %c0_26 = arith.constant 0 : index
    %c0_27 = arith.constant 0 : index
    %32 = vector.load %arg13[%c0_25, %c0_26, %c0_27] : memref<4x16x16xbf16, #tpu.memory_space<vmem>>, vector<4x16x16xbf16>
    "tpu.trace_start"() <{level = 10 : i32, message = "hqd,hkd->hqk"}> : () -> ()
    %cst_28 = arith.constant dense<0.000000e+00> : vector<4x16x16xf32>
    %33 = tpu.matmul %27, %31, %cst_28 {dimension_numbers = #tpu.dot_dimension_numbers<[2], [2], [1], [1], [0, 0, 0, 1, 1, 1], [0], [0]>} : vector<4x16x16xbf16>, vector<4x16x16xbf16>, vector<4x16x16xf32> -> vector<4x16x16xf32>
    "tpu.trace_stop"() : () -> ()
    %cst_29 = arith.constant dense<0xFF800000> : vector<4x16xf32>
    %34 = vector.multi_reduction <maximumf>, %33, %cst_29 [2] : vector<4x16x16xf32> to vector<4x16xf32>
    %35 = vector.shape_cast %34 : vector<4x16xf32> to vector<4x16x1xf32>
    %36 = arith.maximumf %28, %35 : vector<4x16x1xf32>
    %37 = arith.subf %28, %36 : vector<4x16x1xf32>
    %38 = math.exp %37 : vector<4x16x1xf32>
    %39 = vector.broadcast %36 : vector<4x16x1xf32> to vector<4x16x16xf32>
    %40 = arith.subf %33, %39 : vector<4x16x16xf32>
    %41 = math.exp %40 : vector<4x16x16xf32>
    %42 = arith.mulf %38, %29 : vector<4x16x1xf32>
    %cst_30 = arith.constant dense<0.000000e+00> : vector<4x16xf32>
    %43 = vector.multi_reduction <add>, %41, %cst_30 [2] : vector<4x16x16xf32> to vector<4x16xf32>
    %44 = vector.shape_cast %43 : vector<4x16xf32> to vector<4x16x1xf32>
    %45 = arith.addf %42, %44 : vector<4x16x1xf32>
    %46 = vector.broadcast %38 : vector<4x16x1xf32> to vector<4x16x16xf32>
    %47 = arith.mulf %46, %30 : vector<4x16x16xf32>
    %48 = arith.truncf %41 : vector<4x16x16xf32> to vector<4x16x16xbf16>
    "tpu.trace_start"() <{level = 10 : i32, message = "hqk,hkd->hqd"}> : () -> ()
    %cst_31 = arith.constant dense<0.000000e+00> : vector<4x16x16xf32>
    %49 = tpu.matmul %48, %32, %cst_31 {dimension_numbers = #tpu.dot_dimension_numbers<[2], [1], [1], [2], [0, 0, 0, 1, 1, 2], [0], [0]>} : vector<4x16x16xbf16>, vector<4x16x16xbf16>, vector<4x16x16xf32> -> vector<4x16x16xf32>
    "tpu.trace_stop"() : () -> ()
    %50 = arith.addf %47, %49 : vector<4x16x16xf32>
    %51 = tpu.reciprocal %45 {approx = true} : vector<4x16x1xf32> -> vector<4x16x1xf32>
    %52 = vector.broadcast %51 : vector<4x16x1xf32> to vector<4x16x16xf32>
    %53 = arith.mulf %50, %52 : vector<4x16x16xf32>
    %54 = vector.extract_strided_slice %53 {offsets = [0, 0, 0], sizes = [1, 16, 16], strides = [1, 1, 1]} : vector<4x16x16xf32> to vector<1x16x16xf32>
    %55 = vector.shape_cast %54 : vector<1x16x16xf32> to vector<16x16xf32>
    %56 = arith.truncf %55 : vector<16x16xf32> to vector<16x16xbf16>
    %c0_32 = arith.constant 0 : index
    %c0_33 = arith.constant 0 : index
    %57 = vector.load %arg15[%c0_32, %c0_33] : memref<16x64xbf16, #tpu.memory_space<vmem>>, vector<16x16xbf16>
    tpu.vector_store %arg15[%c0_32, %c0_33], %56 {strides = array<i32>} : memref<16x64xbf16, #tpu.memory_space<vmem>>, vector<16x16xbf16>,
    %58 = vector.extract_strided_slice %53 {offsets = [1, 0, 0], sizes = [1, 16, 16], strides = [1, 1, 1]} : vector<4x16x16xf32> to vector<1x16x16xf32>
    %59 = vector.shape_cast %58 : vector<1x16x16xf32> to vector<16x16xf32>
    %60 = arith.truncf %59 : vector<16x16xf32> to vector<16x16xbf16>
    %c0_34 = arith.constant 0 : index
    %c16 = arith.constant 16 : index
    %61 = vector.load %arg15[%c0_34, %c16] : memref<16x64xbf16, #tpu.memory_space<vmem>>, vector<16x16xbf16>
    tpu.vector_store %arg15[%c0_34, %c16], %60 {strides = array<i32>} : memref<16x64xbf16, #tpu.memory_space<vmem>>, vector<16x16xbf16>,
    %62 = vector.extract_strided_slice %53 {offsets = [2, 0, 0], sizes = [1, 16, 16], strides = [1, 1, 1]} : vector<4x16x16xf32> to vector<1x16x16xf32>
    %63 = vector.shape_cast %62 : vector<1x16x16xf32> to vector<16x16xf32>
    %64 = arith.truncf %63 : vector<16x16xf32> to vector<16x16xbf16>
    %c0_35 = arith.constant 0 : index
    %c32 = arith.constant 32 : index
    %65 = vector.load %arg15[%c0_35, %c32] : memref<16x64xbf16, #tpu.memory_space<vmem>>, vector<16x16xbf16>
    tpu.vector_store %arg15[%c0_35, %c32], %64 {strides = array<i32>} : memref<16x64xbf16, #tpu.memory_space<vmem>>, vector<16x16xbf16>,
    %66 = vector.extract_strided_slice %53 {offsets = [3, 0, 0], sizes = [1, 16, 16], strides = [1, 1, 1]} : vector<4x16x16xf32> to vector<1x16x16xf32>
    %67 = vector.shape_cast %66 : vector<1x16x16xf32> to vector<16x16xf32>
    %68 = arith.truncf %67 : vector<16x16xf32> to vector<16x16xbf16>
    %c0_36 = arith.constant 0 : index
    %c48 = arith.constant 48 : index
    %69 = vector.load %arg15[%c0_36, %c48] : memref<16x64xbf16, #tpu.memory_space<vmem>>, vector<16x16xbf16>
    tpu.vector_store %arg15[%c0_36, %c48], %68 {strides = array<i32>} : memref<16x64xbf16, #tpu.memory_space<vmem>>, vector<16x16xbf16>,
    %c0_37 = arith.constant 0 : index
    %c0_38 = arith.constant 0 : index
    %70 = vector.load %arg15[%c0_37, %c0_38] : memref<16x64xbf16, #tpu.memory_space<vmem>>, vector<16x64xbf16>
    %c0_39 = arith.constant 0 : index
    %c0_40 = arith.constant 0 : index
    %71 = vector.load %arg9[%c0_39, %c0_40] : memref<64x64xbf16, #tpu.memory_space<vmem>>, vector<64x64xbf16>
    %cst_41 = arith.constant dense<0.000000e+00> : vector<16x64xf32>
    %72 = tpu.matmul %70, %71, %cst_41 {dimension_numbers = #tpu.dot_dimension_numbers<[1], [0], [0], [1], [0, 0, 1, 1], [], []>} : vector<16x64xbf16>, vector<64x64xbf16>, vector<16x64xf32> -> vector<16x64xf32>
    %c0_42 = arith.constant 0 : index
    %c0_43 = arith.constant 0 : index
    %73 = vector.load %arg10[%c0_42, %c0_43] : memref<1x64xf32, #tpu.memory_space<vmem>>, vector<1x64xf32>
    %74 = vector.broadcast %73 : vector<1x64xf32> to vector<16x64xf32>
    %75 = arith.addf %72, %74 : vector<16x64xf32>
    %c0_44 = arith.constant 0 : index
    %c0_45 = arith.constant 0 : index
    %c0_46 = arith.constant 0 : index
    %76 = vector.load %arg11[%c0_44, %c0_45, %c0_46] : memref<1x16x64xf32, #tpu.memory_space<vmem>>, vector<1x16x64xf32>
    %77 = vector.shape_cast %76 : vector<1x16x64xf32> to vector<16x64xf32>
    %78 = vector.shape_cast %75 : vector<16x64xf32> to vector<1x16x64xf32>
    tpu.vector_store %arg11[%c0_44, %c0_45, %c0_46], %78 {strides = array<i32>} : memref<1x16x64xf32, #tpu.memory_space<vmem>>, vector<1x16x64xf32>,
    return
  }
  func.func @transform_0(%arg0: i32, %arg1: i32) -> (i32, i32, i32) {
    %c0_i32 = arith.constant 0 : i32
    %c0_i32_0 = arith.constant 0 : i32
    %c0_i32_1 = arith.constant 0 : i32
    return %arg0, %c0_i32, %c0_i32_0 : i32, i32, i32
  }
  func.func @transform_1(%arg0: i32, %arg1: i32) -> (i32, i32) {
    %c0_i32 = arith.constant 0 : i32
    %c0_i32_0 = arith.constant 0 : i32
    %c0_i32_1 = arith.constant 0 : i32
    return %c0_i32, %c0_i32_0 : i32, i32
  }
  func.func @transform_2(%arg0: i32, %arg1: i32) -> (i32, i32) {
    %c0_i32 = arith.constant 0 : i32
    %c0_i32_0 = arith.constant 0 : i32
    %c0_i32_1 = arith.constant 0 : i32
    return %c0_i32, %c0_i32_0 : i32, i32
  }
  func.func @transform_3(%arg0: i32, %arg1: i32) -> (i32, i32) {
    %c0_i32 = arith.constant 0 : i32
    %c0_i32_0 = arith.constant 0 : i32
    %c0_i32_1 = arith.constant 0 : i32
    return %c0_i32, %c0_i32_0 : i32, i32
  }
  func.func @transform_4(%arg0: i32, %arg1: i32) -> (i32, i32) {
    %c0_i32 = arith.constant 0 : i32
    %c0_i32_0 = arith.constant 0 : i32
    %c0_i32_1 = arith.constant 0 : i32
    return %c0_i32, %c0_i32_0 : i32, i32
  }
  func.func @transform_5(%arg0: i32, %arg1: i32) -> (i32, i32) {
    %c0_i32 = arith.constant 0 : i32
    %c0_i32_0 = arith.constant 0 : i32
    %c0_i32_1 = arith.constant 0 : i32
    return %c0_i32, %c0_i32_0 : i32, i32
  }
  func.func @transform_6(%arg0: i32, %arg1: i32) -> (i32, i32) {
    %c0_i32 = arith.constant 0 : i32
    %c0_i32_0 = arith.constant 0 : i32
    %c0_i32_1 = arith.constant 0 : i32
    return %c0_i32, %c0_i32_0 : i32, i32
  }
  func.func @transform_7(%arg0: i32, %arg1: i32) -> (i32, i32) {
    %c0_i32 = arith.constant 0 : i32
    %c0_i32_0 = arith.constant 0 : i32
    %c0_i32_1 = arith.constant 0 : i32
    return %c0_i32, %c0_i32_0 : i32, i32
  }
  func.func @transform_8(%arg0: i32, %arg1: i32) -> (i32, i32) {
    %c0_i32 = arith.constant 0 : i32
    %c0_i32_0 = arith.constant 0 : i32
    %c0_i32_1 = arith.constant 0 : i32
    return %c0_i32, %c0_i32_0 : i32, i32
  }
  func.func @transform_9(%arg0: i32, %arg1: i32) -> (i32, i32, i32) {
    %c0_i32 = arith.constant 0 : i32
    %c0_i32_0 = arith.constant 0 : i32
    return %arg0, %arg1, %c0_i32 : i32, i32, i32
  }
}

</mosaic_0001>

<bundles_post_ra>
// kernel: tpu_custom_call.1
= control target key start
LH: loop header
LB: loop body
LE: loop exit
PB: predicated region body
PF: predicated region fallthrough
CT: control target
= control target key end

     0   :  { %s2667_s0 = inlined_call_operand.hbm [shape: bf16[2,16,64], index: 0, kind: input, shape index: {}]   ;;  %s2668_s1 = inlined_call_operand.hbm [shape: bf16[64,64], index: 1, kind: input, shape index: {}]   ;;  %s2669_s2 = inlined_call_operand.vmem [shape: f32[1,64], index: 2, kind: input, shape index: {}]   ;;  %s2670_s3 = inlined_call_operand.hbm [shape: bf16[64,64], index: 3, kind: input, shape index: {}]   ;;  %s2671_s4 = inlined_call_operand.vmem [shape: f32[1,64], index: 4, kind: input, shape index: {}]   ;;  %s2672_s5 = inlined_call_operand.hbm [shape: bf16[64,64], index: 5, kind: input, shape index: {}]   ;;  %s2673_s6 = inlined_call_operand.vmem [shape: f32[1,64], index: 6, kind: input, shape index: {}]   ;;  %s2674_s7 = inlined_call_operand.hbm [shape: bf16[64,64], index: 7, kind: input, shape index: {}]   ;;  %s2675_s8 = inlined_call_operand.vmem [shape: f32[1,64], index: 8, kind: input, shape index: {}]   ;;  %s2676_s9 = inlined_call_operand.hbm [shape: f32[2,16,64], index: 9, kind: output, shape index: {}]  }
   0x1   :  { %2684 = sst [smem:[#allocation23_spill]] %s2673_s6 }
   0x2   :  { %2685 = sst [smem:[#allocation24_spill]] %s2675_s8 }
   0x3   :  { %2686 = sst [smem:[#allocation25_spill]] %s2676_s9 }
   0x4   :  { %14 = vsyncpa [#allocation7], 0 }
   0x5   :  { %16 = vsyncpa [#allocation7 + $0x1], 0 }
   0x6   :  { %17 = vsyncpa [#allocation10], 0 }
   0x7   :  { %18 = vsyncpa [#allocation13], 0 }
   0x8   :  { %19 = vsyncpa [#allocation8], 0 }
   0x9   :  { %21 = vsyncpa [#allocation8 + $0x1], 0  ;;  %s2184_s30 = smov 0   ;;  %s2186_s10 = smov 0  }
   0xa   :  { %s2188_s11 = smov 0   ;;  %s2190_s12 = smov 0  }
   0xb   :  { %s2192_s13 = smov 0   ;;  %s2194_s14 = smov 0  }
   0xc LB: > { %2687 = sst [smem:[#allocation20_spill]] %s2094_s30  ;;  %s1510_s15 = sadd.s32 4294967295, %s2114_s14   ;;  %s2114_s14 = sphi %s2194_s14, %s27_s14   ;;  %s2110_s13 = sphi %s2192_s13, %s2716_s13   ;;  %s2106_s12 = sphi %s2190_s12, %s2715_s12   ;;  %s2102_s11 = sphi %s2188_s11, %s2714_s11   ;;  %s2098_s10 = sphi %s2186_s10, %s2713_s10   ;;  %s2094_s30 = sphi %s2184_s30, %s2712_s30  }
   0xd   : > { %2688 = sst [smem:[#allocation21_spill]] %s2106_s12  ;;  %s1511_s16 = sadd.s32 4294967294, %s2114_s14  }
   0xe   : > { %p59_p0 = scmp.ne.s32.totalorder %s2098_s10, %s2094_s30  ;;  %p2218_p1 = scmp.eq.s32.totalorder %s1510_s15, 0 }
   0xf   : > { %p2222_p2 = scmp.eq.s32.totalorder %s1510_s15, 1  ;;  %p259_p3 = scmp.eq.s32.totalorder %s1511_s16, 1 }
  0x10   : > { %s2689_s17 = scalar_select %p2218_p1, 1, 0 }
  0x11   : > { %s2690_s18 = scalar_select %p2222_p2, 1, 0 }
  0x12   : > { %p2228_p4 = por %p2218_p1, %p59_p0  ;;  %p1512_p5 = scmp.ge.s32.totalorder %s2114_s14, 1 }
  0x13   : > { %p2233_p6 = por %p259_p3, %p59_p0  ;;  %p266_p7 = scmp.lt.s32.totalorder %s2114_s14, 3 }
  0x14   : > { %s2691_s19 = scalar_select %p2228_p4, 1, 0 }
  0x15   : > { %s2692_s20 = scalar_select %p2233_p6, 1, 0 }
  0x16   : > { %p2238_p8 = pnand %p1512_p5, %p266_p7  ;;  %s2116_s22 = smov [#allocation9]  }
  0x17   : > { %2693 = sst [smem:[#allocation22_spill]] %s2692_s20  ;;  %s278_s23 = sshll.u32 %s2116_s22, 4  ;;  %s2242_s23 = int_to_ptr.vmem [resolvable:$true] %s278_s23 }
  0x18   : > { %s2694_s21 = scalar_select %p2238_p8, 1, 0 }
  0x19   : > { %p1721_p9 = pneg %p2238_p8  ;;  %s2117_s25 = smov [#allocation12]  }
  0x1a   : > { %s310_s26 = sshll.u32 %s2117_s25, 4  ;;  %s2118_s27 = smov [#allocation11]   ;;  %s2253_s26 = int_to_ptr.vmem [resolvable:$true] %s310_s26 }
  0x1b   : > { %p2249_p11 = pnand %p1721_p9, %p2218_p1  ;;  %s2255_s28 = sshll.u32 %s2118_s27, 4  ;;  %s295_s28 = int_to_ptr.vmem [resolvable:$true] %s2255_s28 }
  0x1c   : > { %s1882_s16 = scalar_lea.hbm %s2668_s1, 512 }
  0x1d   : > { %p1883_p12 = scmp.ne.s32.totalorder %s2668_s1, %s1882_s16  ;;  %p2265_p13 = pneg %p2249_p11 }
  0x1e   : > { %p1889_p5 = scmp.lt.u32.totalorder %s1882_s16, %s2668_s1 }
  0x1f   : > { %p1885_p0 = pnand %p2265_p13, %p1883_p12 }
  0x21   : > { %p1886_p3 = pneg %p1885_p0 }
  0x23   : > { %p1891_p7 = pnand %p1889_p5, %p1886_p3 }
  0x25   : > { %1894 = shalt.err (!%p1891_p7)
}
  0x26   : > { %s1895_s20 = scalar_lea.vmem %s2242_s23, 512  ;;  %p1903_p1 = scmp.lt.s32.totalorder %s2242_s23, %s2242_s23 }
  0x27   : > { %p1896_p9 = scmp.ne.s32.totalorder %s2242_s23, %s1895_s20  ;;  %p1904_p4 = scmp.lt.s32.totalorder %s1895_s20, %s1895_s20 }
  0x29   : > { %p1898_p10 = pnand %p1896_p9, %p2265_p13  ;;  %p1905_p12 = por %p1904_p4, %p1903_p1 }
  0x2b   : > { %p1899_p6 = pneg %p1898_p10 }
  0x2d   : > { %p1906_p0 = pnand %p1905_p12, %p1899_p6 }
  0x2f   : > { %1909 = shalt.err (!%p1906_p0)
}
  0x30   : > { %s2119_s29 = smov 64   ;;  %s2120_s15 = smov 4  }
  0x31   : > { %1724 = dma.hbm_to_vmem [thread:$0]  (!%p2249_p11), %s2668_s1, 512, %s2242_s23, [#allocation10], %s2119_s29, %s2119_s29, %s2120_s15  }
  0x32   : > { %s1910_s20 = scalar_lea.hbm %s2672_s5, 512 }
  0x33   : > { %p1911_p1 = scmp.ne.s32.totalorder %s2672_s5, %s1910_s20  ;;  %p1917_p10 = scmp.lt.u32.totalorder %s1910_s20, %s2672_s5 }
  0x35   : > { %p1913_p4 = pnand %p1911_p1, %p2265_p13 }
  0x37   : > { %p1914_p6 = pneg %p1913_p4 }
  0x39   : > { %p1919_p3 = pnand %p1917_p10, %p1914_p6 }
  0x3b   : > { %1922 = shalt.err (!%p1919_p3)
}
  0x3c   : > { %s1923_s23 = scalar_lea.vmem %s2253_s26, 512  ;;  %p1931_p12 = scmp.lt.s32.totalorder %s2253_s26, %s2253_s26 }
  0x3d   : > { %p1924_p5 = scmp.ne.s32.totalorder %s2253_s26, %s1923_s23  ;;  %p1932_p0 = scmp.lt.s32.totalorder %s1923_s23, %s1923_s23 }
  0x3f   : > { %p1926_p7 = pnand %p1924_p5, %p2265_p13  ;;  %p1933_p1 = por %p1932_p0, %p1931_p12 }
  0x41   : > { %p1927_p9 = pneg %p1926_p7 }
  0x43   : > { %p1934_p4 = pnand %p1933_p1, %p1927_p9 }
  0x45   : > { %1937 = shalt.err (!%p1934_p4)
}
  0x46   : > { %1730 = dma.hbm_to_vmem [thread:$0]  (!%p2249_p11), %s2672_s5, 512, %s2253_s26, [#allocation13], %s2119_s29, %s2119_s29, %s2120_s15  }
  0x47   : > { %s1938_s16 = scalar_lea.hbm %s2670_s3, 512 }
  0x48   : > { %p1939_p6 = scmp.ne.s32.totalorder %s2670_s3, %s1938_s16  ;;  %p1945_p5 = scmp.lt.u32.totalorder %s1938_s16, %s2670_s3 }
  0x4a   : > { %p1941_p10 = pnand %p1939_p6, %p2265_p13 }
  0x4c   : > { %p1942_p3 = pneg %p1941_p10 }
  0x4e   : > { %p1947_p7 = pnand %p1945_p5, %p1942_p3 }
  0x50   : > { %1950 = shalt.err (!%p1947_p7)
}
  0x51   : > { %s1951_s23 = scalar_lea.vmem %s295_s28, 512  ;;  %p1959_p1 = scmp.lt.s32.totalorder %s295_s28, %s295_s28 }
  0x52   : > { %p1952_p9 = scmp.ne.s32.totalorder %s295_s28, %s1951_s23  ;;  %p1960_p4 = scmp.lt.s32.totalorder %s1951_s23, %s1951_s23 }
  0x54   : > { %p1954_p12 = pnand %p1952_p9, %p2265_p13  ;;  %p1961_p8 = por %p1960_p4, %p1959_p1 }
  0x56   : > { %p1955_p0 = pneg %p1954_p12 }
  0x58   : > { %p1962_p2 = pnand %p1961_p8, %p1955_p0 }
  0x5a   : > { %1965 = shalt.err (!%p1962_p2)
}
  0x5b   : > { %1727 = dma.hbm_to_vmem [thread:$0]  (!%p2249_p11), %s2670_s3, 512, %s295_s28, [#allocation10], %s2119_s29, %s2119_s29, %s2120_s15  }
  0x5c   : > { %s2121_s8 = smov [#allocation14]   ;;  %s1966_s22 = scalar_lea.hbm %s2674_s7, 512 }
  0x5d   : > { %s326_s9 = sshll.u32 %s2121_s8, 4  ;;  %p1967_p2 = scmp.ne.s32.totalorder %s2674_s7, %s1966_s22  ;;  %s327_s9 = int_to_ptr.vmem [resolvable:$true] %s326_s9 }
  0x5e   : > { %p1973_p10 = scmp.lt.u32.totalorder %s1966_s22, %s2674_s7 }
  0x5f   : > { %p1969_p8 = pnand %p1967_p2, %p2265_p13 }
  0x61   : > { %p1970_p6 = pneg %p1969_p8 }
  0x63   : > { %p1975_p3 = pnand %p1973_p10, %p1970_p6 }
  0x65   : > { %1978 = shalt.err (!%p1975_p3)
}
  0x66   : > { %s1979_s28 = scalar_lea.vmem %s327_s9, 512  ;;  %p1987_p12 = scmp.lt.s32.totalorder %s327_s9, %s327_s9 }
  0x67   : > { %p1980_p5 = scmp.ne.s32.totalorder %s327_s9, %s1979_s28  ;;  %p1988_p0 = scmp.lt.s32.totalorder %s1979_s28, %s1979_s28 }
  0x69   : > { %p1982_p7 = pnand %p1980_p5, %p2265_p13  ;;  %p1989_p1 = por %p1988_p0, %p1987_p12 }
  0x6b   : > { %p1983_p9 = pneg %p1982_p7 }
  0x6d   : > { %p1990_p4 = pnand %p1989_p1, %p1983_p9 }
  0x6f   : > { %1993 = shalt.err (!%p1990_p4)
}
  0x70   : > { %1733 = dma.hbm_to_vmem [thread:$0]  (!%p2249_p11), %s2674_s7, 512, %s327_s9, [#allocation13], %s2119_s29, %s2119_s29, %s2120_s15  }
  0x71   : > { %s39_s30 = sadd.s32 1, %s2110_s13  ;;  %s46_s24 = sadd.s32 1, %s2102_s11 }
  0x72   : > { %p41_p13 = scmp.ge.s32.totalorder %s39_s30, 2  ;;  %p53_p2 = scmp.ne.s32.totalorder %s2102_s11, %s2098_s10 }
  0x73   : > { %p54_p8 = scmp.eq.s32.totalorder %s2114_s14, 0  ;;  %p1746_p6 = scmp.lt.s32.totalorder %s2114_s14, 2 }
  0x74   : > { %s2718_s30 = smov (%p41_p13, %s39_s30), 0  ;;  %p2697_p3 = scmp.ne.s32.totalorder %s2690_s18, 0 }
  0x75   : > { %p55_p10 = por %p54_p8, %p53_p2  ;;  %s43_s12 = ssub.s32 %s2110_s13, %s2718_s30 }
  0x76   : > { %p2368_p5 = por %p2697_p3, %p53_p2  ;;  %s343_s16 = sand.u32 1, %s2102_s11  }
  0x77   : > { %p44_p7 = scmp.eq.s32.totalorder %s43_s12, 0  ;;  %s1518_s9 = sshll.u32 %s343_s16, 3 }
  0x78   : > { %s1567_s22 = sshll.u32 %s2110_s13, 7  ;;  %s347_s18 = scalar_lea.vmem [#allocation6], %s1518_s9 }
  0x79   : > { %s2377_s25 = scalar_select %p44_p7, %s2102_s11, %s46_s24  }
  0x7a   : > { %s2382_s23 = scalar_lea.hbm %s2667_s0, %s1567_s22  ;;  %s354_s28 = sshll.u32 %s347_s18, 4  ;;  %s2390_s28 = int_to_ptr.vmem [resolvable:$true] %s354_s28 }
  0x7b   : > { %p2386_p11 = pnand %p1746_p6, %p55_p10  ;;  %s2392_s6 = scalar_lea.sflag [#allocation7], %s343_s16 }
  0x7c   : > { %s1994_s24 = scalar_lea.hbm %s2382_s23, 128  ;;  %s1999_s22 = scalar_lea.hbm %s2667_s0, 256 }
  0x7d   : > { %p1995_p9 = scmp.ne.s32.totalorder %s2382_s23, %s1994_s24  ;;  %p1996_p12 = pneg %p2386_p11 }
  0x7e   : > { %p2000_p4 = scmp.lt.u32.totalorder %s2382_s23, %s2667_s0  ;;  %p2001_p13 = scmp.lt.u32.totalorder %s1999_s22, %s1994_s24 }
  0x7f   : > { %p1997_p0 = pnand %p1996_p12, %p1995_p9  ;;  %p2003_p8 = scmp.lt.u32.totalorder %s1994_s24, %s2382_s23 }
  0x80   : > { %p2002_p2 = por %p2001_p13, %p2000_p4 }
  0x81   : > { %p1998_p1 = pneg %p1997_p0 }
  0x82   : > { %p2004_p6 = por %p2003_p8, %p2002_p2 }
  0x84   : > { %p2005_p10 = pnand %p2004_p6, %p1998_p1 }
  0x86   : > { %2008 = shalt.err (!%p2005_p10)
}
  0x87   : > { %s2009_s16 = scalar_lea.vmem %s2390_s28, 128  ;;  %s2122_s18 = smov [#allocation6]  }
  0x88   : > { %p2010_p3 = scmp.ne.s32.totalorder %s2390_s28, %s2009_s16  ;;  %s2014_s12 = sshll.u32 %s2122_s18, 4  ;;  %s2015_s12 = int_to_ptr.vmem [resolvable:$false] %s2014_s12 }
  0x89   : > { %s2016_s9 = scalar_lea.vmem %s2015_s12, 256  ;;  %p2017_p0 = scmp.lt.s32.totalorder %s2390_s28, %s2015_s12 }
  0x8a   : > { %p2012_p7 = pnand %p2010_p3, %p1996_p12  ;;  %p2018_p4 = scmp.lt.s32.totalorder %s2016_s9, %s2009_s16 }
  0x8c   : > { %p2013_p9 = pneg %p2012_p7  ;;  %p2019_p13 = por %p2018_p4, %p2017_p0 }
  0x8e   : > { %p2020_p2 = pnand %p2019_p13, %p2013_p9 }
  0x90   : > { %2023 = shalt.err (!%p2020_p2)
}
  0x91   : > { %1737 = dma.hbm_to_vmem [thread:$0]  (!%p2386_p11), %s2382_s23, 128, %s2390_s28, %s2392_s6, %s2119_s29, %s2119_s29, %s2120_s15  }
  0x92   : > { %p2700_p12 = scmp.ne.s32.totalorder %s2694_s21, 0 }
  0x93   : > { %s2426_s24 = sand.u32 (!%p2700_p12), 1, %s2098_s10   ;;  %p2701_p1 = scmp.ne.s32.totalorder (!%p2700_p12), %s2691_s19, 0 }
  0x94   : > { %366 = sbr.rel (%p2700_p12) target bundleno = 1502 (0x5de), region = 56  ;;  %s1522_s22 = sshll.u32 (!%p2700_p12), %s2426_s24, 3 }
  0x95   : > { %s369_s27 = scalar_lea.sflag (!%p2700_p12), [#allocation7], %s2426_s24  ;;  %s2430_s20 = scalar_lea.vmem (!%p2700_p12), [#allocation6], %s1522_s22 }
  0x9b   : > { %2077 = dma.done.wait (%p2701_p1), %s369_s27, 128  }
  0x9c   : > { %2079 = vsyncadd (%p2701_p1), %s369_s27, 4294967168  ;;  %p2702_p11 = scmp.ne.s32.totalorder %s2689_s17, 0 }
  0x9e   : > { %2081 = dma.done.wait (%p2702_p11), [#allocation10], 1024  }
  0x9f   : > { %2083 = vsyncadd (%p2702_p11), [#allocation10], 4294966272 }
  0xa0   : > { %2085 = dma.done.wait (%p2702_p11), [#allocation13], 1024  }
  0xa1   : > { %2087 = vsyncadd (%p2702_p11), [#allocation13], 4294966272  ;;  %v2123_v0 = vmov 0.0   ;;  %vm2124_vm0 = vmmov 0   ;;  %v1816_v1 = vld [vmem:[#allocation11] sm:$0xff]   ;;  %v1817_v2 = vld [vmem:[#allocation11 + $0x8] sm:$0xff]  }
  0xa2   : > { %1605 = vmatprep.subr.bf16.mxu0 %v2123_v0  ;;  %1613 = vmatprep.mubr.msk.bf16.mxu0 %vm2124_vm0, %v2123_v0  ;;  %v1818_v3 = vld [vmem:[#allocation11 + $0x10] sm:$0xff]   ;;  %v1819_v4 = vld [vmem:[#allocation11 + $0x18] sm:$0xff]   ;;  %v1826_v5 = vld [vmem:[#allocation12] sm:$0xff]   ;;  %vm475_vm1 = vcmask 523264   ;;  %vm521_vm2 = vcmask 130048   ;;  %s2125_s21 = smov 112  }
  0xa3   : > { %1617 = vmatprep.subr.bf16.mxu1 %v2123_v0  ;;  %1625 = vmatprep.mubr.msk.bf16.mxu1 %vm2124_vm0, %v2123_v0  ;;  %v1820_v6 = vld [vmem:[%s2430_s20] sm:$0xff]   ;;  %v1827_v7 = vld [vmem:[#allocation12 + $0x8] sm:$0xff]   ;;  %v1821_v8 = vld [vmem:[#allocation9] sm:$0xff]   ;;  %s2126_s29 = smov 96   ;;  %s2127_s28 = smov 80   ;;  %vm1270_vm3 = vcmask 261248  }
  0xa4   : > { %1606 = vmatpush3.bf16.msra.mxu0 %v1816_v1  ;;  %1618 = vmatpush3.bf16.msra.mxu1 %v1826_v5  ;;  %v1828_v9 = vld [vmem:[#allocation12 + $0x10] sm:$0xff]   ;;  %v1822_v10 = vld [vmem:[#allocation9 + $0x8] sm:$0xff]   ;;  %v1829_v11 = vld [vmem:[#allocation12 + $0x18] sm:$0xff]   ;;  %s2703_s16 = sld [smem:[#allocation23_spill]]  ;;  %s2128_s18 = smov 16   ;;  %vm1277_vm4 = vcmask 392448  }
  0xa5   : > { %1607 = vmatprep.subr.bf16.mxu0 %v2123_v0  ;;  %1619 = vmatprep.subr.bf16.mxu1 %v2123_v0  ;;  %v1823_v12 = vld [vmem:[#allocation9 + $0x10] sm:$0xff]   ;;  %v1824_v13 = vld [vmem:[#allocation9 + $0x18] sm:$0xff]   ;;  %v1528_v15 = vld [vmem:[%s2671_s4] ss:$0 sm:$0xff]  ;;  %s2129_s12 = smov 32   ;;  %s2130_s9 = smov 48  }
  0xa6   : > { %v1825_v14 = vld [vmem:[%s2430_s20] sm:$0xff]   ;;  %v1541_v25 = vld [vmem:[%s2669_s2] ss:$0 sm:$0xff]  ;;  %s2704_s22 = sld [smem:[#allocation21_spill]]  ;;  %vm1284_vm5 = vcmask 523648   ;;  %s1527_s27 = sshll.u32 %s2426_s24, 4 }
  0xa7   : > { %s2705_s19 = sld [smem:[#allocation24_spill]]  ;;  %s2706_s26 = sld [smem:[#allocation25_spill]] }
  0xa8   : > { %1608 = vmatpush3.bf16.msra.mxu0 %v1817_v2  ;;  %1620 = vmatpush3.bf16.msra.mxu1 %v1827_v7 }
  0xa9   : > { %1609 = vmatprep.subr.bf16.mxu0 %v2123_v0  ;;  %1621 = vmatprep.subr.bf16.mxu1 %v2123_v0 }
  0xaa   : > { %v1535_v34 = vld [vmem:[%s2703_s16] ss:$0 sm:$0xff]  ;;  %s1373_s16 = scalar_lea.sflag [#allocation8], %s2426_s24 }
  0xac   : > { %1610 = vmatpush3.bf16.msra.mxu0 %v1818_v3  ;;  %1622 = vmatpush3.bf16.msra.mxu1 %v1828_v9  ;;  %s1568_s15 = sshll.u32 %s2704_s22, 8 }
  0xad   : > { %1611 = vmatprep.subr.bf16.mxu0 %v2123_v0  ;;  %1623 = vmatprep.subr.bf16.mxu1 %v2123_v0  ;;  %s2616_s6 = scalar_lea.hbm %s2706_s26, %s1568_s15 }
  0xb0   : > { %1612 = vmatpush3.bf16.msra.mxu0 %v1819_v4  ;;  %1624 = vmatpush3.bf16.msra.mxu1 %v1829_v11 }
  0xb1   : > { %1629 = vmatprep.subr.bf16.mxu0 %v2123_v0  ;;  %1641 = vmatprep.subr.bf16.mxu1 %v2123_v0 }
  0xb3   : > { %1614 = vmatmul.mubr.msk.bf16.vlgmr.msra.gmra.mrb[0].mxu0 %vm475_vm1, %v1820_v6  ;;  %1626 = vmatmul.mubr.msk.bf16.vlgmr.msra.gmra.mrb[0].mxu1 %vm475_vm1, %v1820_v6 }
  0xb4   : > { %1630 = vmatpush3.bf16.msra.mxu0 %v1821_v8  ;;  %1637 = vmatprep.mubr.msk.bf16.mxu0 %vm2124_vm0, %v2123_v0 }
  0xb5   : > { %1631 = vmatprep.subr.bf16.mxu0 %v2123_v0  ;;  %1643 = vmatprep.mubr.msk.bf16.mxu1 %vm2124_vm0, %v2123_v0 }
  0xb8   : > { %1632 = vmatpush3.bf16.msra.mxu0 %v1822_v10 }
  0xb9   : > { %1633 = vmatprep.subr.bf16.mxu0 %v2123_v0 }
  0xbc   : > { %1634 = vmatpush3.bf16.msra.mxu0 %v1823_v12 }
  0xbd   : > { %1635 = vmatprep.subr.bf16.mxu0 %v2123_v0 }
  0xc0   : > { %1636 = vmatpush3.bf16.msra.mxu0 %v1824_v13 }
  0xc1   : > { %1665 = vmatprep.subr.bf16.mxu0 %v2123_v0 }
  0xc3   : > { %1638 = vmatmul.mubr.msk.bf16.vlgmr.msra.gmra.mrb[4].mxu0 %vm475_vm1, %v1825_v14 }
  0xc4   : > { %1667 = vmatprep.mubr.msk.bf16.mxu0 %vm2124_vm0, %v2123_v0 }
 0x186   : > { %v513_v16 = vpop.f32.mrb[0].mxu0  ;;  %v612_v35 = vpop.f32.mrb[0].mxu1 }
 0x187   : > { %v514_v17 = vadd.f32 %v1528_v15, %v513_v16  ;;  %v1615_v18 = vpop.f32.mrb[1].mxu0  ;;  %v613_v36 = vadd.f32 %v1535_v34, %v612_v35  ;;  %v1627_v37 = vpop.f32.mrb[1].mxu1 }
 0x188   : > { %v516_v19 = vpop.f32.mrb[2].mxu0  ;;  %v615_v38 = vpop.f32.mrb[2].mxu1 }
 0x189   : > { %v517_v20 = vadd.f32 %v1528_v15, %v516_v19  ;;  %v1616_v21 = vpop.f32.mrb[3].mxu0  ;;  %v616_v39 = vadd.f32 %v1535_v34, %v615_v38  ;;  %v1628_v40 = vpop.f32.mrb[3].mxu1 }
 0x18b   : > { %v520_v22 = vpack.c.bf16 %v517_v20, %v514_v17  ;;  %v2495_v41 = vpack.c.bf16 %v616_v39, %v613_v36 }
 0x18d   : > { %522 = vst.msk [vmem:[#allocation2] sm:$0xff] %vm521_vm2, %v520_v22  ;;  %524 = vrot.lane.b32.xlu0 %v520_v22, %s2125_s21  ;;  %620 = vst.msk [vmem:[#allocation3] sm:$0xff] %vm521_vm2, %v2495_v41 }
 0x191   : > { %529 = vrot.lane.b32.xlu0 %v520_v22, %s2126_s29 }
 0x194   : > { %v751_v23 = vld [vmem:[#allocation2] sm:$0xff] }
 0x195   : > { %v763_v24 = vsel %vm521_vm2, %v751_v23, 0  ;;  %v755_v42 = vld [vmem:[#allocation3] sm:$0xff] }
 0x196   : > { %v721_v26 = vpop.f32.mrb[4].mxu0  ;;  %1642 = vmatpush3.bf16.xpose.msra.mxu1 %v763_v24  ;;  %1666 = vmatpush3.bf16.msra.mxu0 %v755_v42 }
 0x197   : > { %v1639_v27 = vpop.f32.mrb[5].mxu0  ;;  %1647 = vmatprep.subr.bf16.mxu1 %v2123_v0  ;;  %v722_v29 = vadd.f32 %v1541_v25, %v721_v26  ;;  %1677 = vmatprep.subr.bf16.mxu0 %v2123_v0 }
 0x198   : > { %v724_v28 = vpop.f32.mrb[6].mxu0 }
 0x199   : > { %v725_v30 = vadd.f32 %v1541_v25, %v724_v28  ;;  %v1640_v31 = vpop.f32.mrb[7].mxu0 }
 0x19b   : > { %v728_v32 = vpack.c.bf16 %v725_v30, %v722_v29 }
 0x19d   : > { %730 = vst.msk [vmem:[#allocation4] sm:$0xff] %vm521_vm2, %v728_v32  ;;  %737 = vrot.lane.b32.xlu0 %v728_v32, %s2126_s29  ;;  %732 = vrot.lane.b32.xlu1 %v728_v32, %s2125_s21 }
 0x1a1   : > { %534 = vrot.lane.b32.xlu1 %v520_v22, %s2127_s28 }
 0x1a4   : > { %v747_v33 = vld [vmem:[#allocation4] sm:$0xff] }
 0x1a5   : > { %742 = vrot.lane.b32.xlu1 %v728_v32, %s2127_s28  ;;  %1644 = vmatmul.mubr.msk.bf16.vlgmr.msra.gmra.mrb[4].mxu1 %vm521_vm2, %v747_v33 }
 0x1a6   : > { %1649 = vmatprep.mubr.msk.bf16.mxu1 %vm2124_vm0, %v2123_v0 }
 0x1a9   : > { %622 = vrot.lane.b32.xlu1 %v2495_v41, %s2125_s21  ;;  %s422_s21 = scalar_lea.vmem [#allocation15], %s1527_s27 }
 0x1ff   : > { %v525_v43 = vpop.permute.xlu0 %524 }
 0x200   : > { %528 = vst.msk [vmem:[#allocation2 + $0x8] sm:$0xff] %vm521_vm2, %v525_v43 }
 0x203   : > { %v530_v44 = vpop.permute.xlu0 %529 }
 0x204   : > { %533 = vst.msk [vmem:[#allocation2 + $0x10] sm:$0xff] %vm521_vm2, %v530_v44 }
 0x207   : > { %v752_v45 = vld [vmem:[#allocation2 + $0x8] sm:$0xff] }
 0x208   : > { %v810_v46 = vsel %vm521_vm2, %v752_v45, 0 }
 0x209   : > { %1648 = vmatpush3.bf16.xpose.msra.mxu1 %v810_v46 }
 0x20a   : > { %1653 = vmatprep.subr.bf16.mxu1 %v2123_v0 }
 0x20b   : > { %v753_v50 = vld [vmem:[#allocation2 + $0x10] sm:$0xff] }
 0x20c   : > { %v857_v53 = vsel %vm521_vm2, %v753_v50, 0 }
 0x20f   : > { %v738_v47 = vpop.permute.xlu0 %737  ;;  %v733_v48 = vpop.permute.xlu1 %732 }
 0x210   : > { %741 = vst.msk [vmem:[#allocation4 + $0x10] sm:$0xff] %vm521_vm2, %v738_v47  ;;  %736 = vst.msk [vmem:[#allocation4 + $0x8] sm:$0xff] %vm521_vm2, %v733_v48 }
 0x213   : > { %v535_v49 = vpop.permute.xlu1 %534 }
 0x214   : > { %538 = vst.msk [vmem:[#allocation2 + $0x18] sm:$0xff] %vm521_vm2, %v535_v49 }
 0x217   : > { %v743_v51 = vpop.permute.xlu1 %742  ;;  %v748_v52 = vld [vmem:[#allocation4 + $0x8] sm:$0xff]  ;;  %v749_v55 = vld [vmem:[#allocation4 + $0x10] sm:$0xff] }
 0x218   : > { %746 = vst.msk [vmem:[#allocation4 + $0x18] sm:$0xff] %vm521_vm2, %v743_v51  ;;  %1650 = vmatmul.mubr.msk.bf16.vlgmr.msra.gmra.mrb[8].mxu1 %vm521_vm2, %v748_v52 }
 0x219   : > { %1654 = vmatpush3.bf16.xpose.msra.mxu1 %v857_v53  ;;  %1655 = vmatprep.mubr.msk.bf16.mxu1 %vm2124_vm0, %v2123_v0 }
 0x21a   : > { %1659 = vmatprep.subr.bf16.mxu1 %v2123_v0 }
 0x21b   : > { %v754_v54 = vld [vmem:[#allocation2 + $0x18] sm:$0xff]  ;;  %v623_v1 = vpop.permute.xlu1 %622 }
 0x21c   : > { %v904_v56 = vsel %vm521_vm2, %v754_v54, 0  ;;  %626 = vst.msk [vmem:[#allocation3 + $0x8] sm:$0xff] %vm521_vm2, %v623_v1 }
 0x21f   : > { %v750_v57 = vld [vmem:[#allocation4 + $0x18] sm:$0xff] }
 0x220   : > { %1656 = vmatmul.mubr.msk.bf16.vlgmr.msra.gmra.mrb[12].mxu1 %vm521_vm2, %v749_v55 }
 0x221   : > { %1660 = vmatpush3.bf16.xpose.msra.mxu1 %v904_v56  ;;  %1661 = vmatprep.mubr.msk.bf16.mxu1 %vm2124_vm0, %v2123_v0 }
 0x222   : > { %1671 = vmatprep.subr.bf16.mxu1 %v2123_v0 }
 0x223   : > { %v756_v2 = vld [vmem:[#allocation3 + $0x8] sm:$0xff] }
 0x228   : > { %1662 = vmatmul.mubr.msk.bf16.vlgmr.msra.gmra.mrb[16].mxu1 %vm521_vm2, %v750_v57 }
 0x229   : > { %1673 = vmatprep.mubr.msk.bf16.mxu1 %vm2124_vm0, %v2123_v0  ;;  %1672 = vmatpush3.bf16.msra.mxu1 %v756_v2 }
 0x22a   : > { %1683 = vmatprep.subr.bf16.mxu1 %v2123_v0 }
 0x278   : > { %v799_v58 = vpop.f32.mrb[4].mxu1 }
 0x279   : > { %v1645_v59 = vpop.f32.mrb[5].mxu1  ;;  %v947_v60 = vsel %vm521_vm2, %v799_v58, -inf }
 0x27a   : > { %948 = vmax.xlane.f32.xlu0 %v947_v60  ;;  %v802_v61 = vpop.f32.mrb[6].mxu1 }
 0x27b   : > { %v1646_v62 = vpop.f32.mrb[7].mxu1  ;;  %v950_v63 = vsel %vm521_vm2, %v802_v61, -inf }
 0x27c   : > { %951 = vmax.xlane.f32.xlu1 %v950_v63 }
 0x2eb   : > { %v846_v3 = vpop.f32.mrb[8].mxu1 }
 0x2ec   : > { %v1651_v4 = vpop.f32.mrb[9].mxu1  ;;  %v953_v5 = vsel %vm521_vm2, %v846_v3, -inf }
 0x2ed   : > { %954 = vmax.xlane.f32.xlu0 %v953_v5  ;;  %v849_v6 = vpop.f32.mrb[10].mxu1 }
 0x2ee   : > { %v1652_v7 = vpop.f32.mrb[11].mxu1  ;;  %v956_v8 = vsel %vm521_vm2, %v849_v6, -inf }
 0x2f1   : > { %957 = vmax.xlane.f32.xlu0 %v956_v8 }
 0x2f3   : > { %v893_v9 = vpop.f32.mrb[12].mxu1 }
 0x2f4   : > { %v1657_v10 = vpop.f32.mrb[13].mxu1  ;;  %v959_v11 = vsel %vm521_vm2, %v893_v9, -inf }
 0x2f5   : > { %960 = vmax.xlane.f32.xlu1 %v959_v11  ;;  %v896_v12 = vpop.f32.mrb[14].mxu1 }
 0x2f6   : > { %v1658_v13 = vpop.f32.mrb[15].mxu1  ;;  %v962_v14 = vsel %vm521_vm2, %v896_v12, -inf }
 0x2f7   : > { %963 = vmax.xlane.f32.xlu0 %v962_v14 }
 0x2fb   : > { %v940_v15 = vpop.f32.mrb[16].mxu1 }
 0x2fc   : > { %v1663_v16 = vpop.f32.mrb[17].mxu1  ;;  %v965_v17 = vsel %vm521_vm2, %v940_v15, -inf }
 0x2fd   : > { %966 = vmax.xlane.f32.xlu1 %v965_v17  ;;  %v943_v18 = vpop.f32.mrb[18].mxu1 }
 0x2fe   : > { %v1664_v19 = vpop.f32.mrb[19].mxu1  ;;  %v968_v20 = vsel %vm521_vm2, %v943_v18, -inf }
 0x2ff   : > { %969 = vmax.xlane.f32.xlu0 %v968_v20 }
 0x307   : > { %v2533_v21 = vpop.xlane.xlu0 %948 }
 0x308   : > { %v995_v22 = vsub.f32 %v799_v58, %v2533_v21  ;;  %v971_v10 = vsub.f32 -inf, %v2533_v21 }
 0x309   : > { %v2536_v23 = vpop.xlane.xlu1 %951 }
 0x30a   : > { %v1003_v24 = vmul.f32 1.442695, %v995_v22  ;;  %v996_v25 = vsub.f32 %v802_v61, %v2536_v23  ;;  %v972_v11 = vsub.f32 -inf, %v2536_v23 }
 0x30c   : > { %v1005_v26 = vmul.f32 1.442695, %v996_v25  ;;  %1834 = vpow2.f32 %v1003_v24  ;;  %v981_v13 = vmul.f32 1.442695, %v972_v11 }
 0x30e   : > { %632 = vrot.lane.b32.xlu1 %v2495_v41, %s2127_s28  ;;  %1836 = vpow2.f32 %v1005_v26 }
 0x315   : > { %627 = vrot.lane.b32.xlu0 %v2495_v41, %s2126_s29  ;;  %s1388_s29 = sshll.u32 %s422_s21, 4  ;;  %s2611_s29 = int_to_ptr.vmem [resolvable:$true] %s1388_s29 }
 0x316   : > { %v2543_v27 = vpop.eup %1834 }
 0x317   : > { %v1027_v4 = vsel %vm521_vm2, %v2543_v27, 0.0 }
 0x318   : > { %v2545_v28 = vpop.eup %1836 }
 0x319   : > { %v1059_v29 = vpack.c.bf16 %v2545_v28, %v2543_v27  ;;  %v1030_v5 = vsel %vm521_vm2, %v2545_v28, 0.0 }
 0x31b   : > { %1668 = vmatmul.mubr.msk.bf16.vlgmr.msra.gmra.mrb[8].mxu0 %vm521_vm2, %v1059_v29 }
 0x31c   : > { %1679 = vmatprep.mubr.msk.bf16.mxu0 %vm2124_vm0, %v2123_v0 }
 0x37a   : > { %v2552_v30 = vpop.xlane.xlu0 %954 }
 0x37b   : > { %v997_v31 = vsub.f32 %v846_v3, %v2552_v30 }
 0x37d   : > { %v1007_v32 = vmul.f32 1.442695, %v997_v31 }
 0x37e   : > { %v2555_v33 = vpop.xlane.xlu0 %957 }
 0x37f   : > { %v998_v34 = vsub.f32 %v849_v6, %v2555_v33  ;;  %1838 = vpow2.f32 %v1007_v32 }
 0x381   : > { %v1009_v35 = vmul.f32 1.442695, %v998_v34 }
 0x382   : > { %v2558_v36 = vpop.xlane.xlu1 %960 }
 0x383   : > { %v999_v37 = vsub.f32 %v893_v9, %v2558_v36  ;;  %1840 = vpow2.f32 %v1009_v35 }
 0x384   : > { %v2561_v38 = vpop.xlane.xlu0 %963 }
 0x385   : > { %v1011_v39 = vmul.f32 1.442695, %v999_v37  ;;  %v1000_v40 = vsub.f32 %v896_v12, %v2561_v38  ;;  %v979_v12 = vmul.f32 1.442695, %v971_v10 }
 0x387   : > { %v1013_v41 = vmul.f32 1.442695, %v1000_v40  ;;  %1842 = vpow2.f32 %v1011_v39  ;;  %v973_v39 = vsub.f32 -inf, %v2552_v30  ;;  %v974_v40 = vsub.f32 -inf, %v2555_v33 }
 0x389   : > { %v1839_v42 = vpop.eup %1838  ;;  %1844 = vpow2.f32 %v1013_v41  ;;  %v983_v41 = vmul.f32 1.442695, %v973_v39 }
 0x38a   : > { %v2564_v43 = vpop.xlane.xlu1 %966  ;;  %v1033_v45 = vsel %vm521_vm2, %v1839_v42, 0.0 }
 0x38b   : > { %v1001_v44 = vsub.f32 %v940_v15, %v2564_v43  ;;  %1034 = vadd.xlane.f32.xlu1 %v1033_v45  ;;  %v976_v45 = vsub.f32 -inf, %v2561_v38 }
 0x38c   : > { %v2568_v46 = vpop.xlane.xlu0 %969 }
 0x38d   : > { %v1015_v47 = vmul.f32 1.442695, %v1001_v44  ;;  %v1002_v48 = vsub.f32 %v943_v18, %v2568_v46  ;;  %v1841_v49 = vpop.eup %1840  ;;  %v975_v44 = vsub.f32 -inf, %v2558_v36 }
 0x38e   : > { %v633_v50 = vpop.permute.xlu1 %632  ;;  %v1036_v52 = vsel %vm521_vm2, %v1841_v49, 0.0  ;;  %v1060_v53 = vpack.c.bf16 %v1841_v49, %v1839_v42  ;;  %v985_v42 = vmul.f32 1.442695, %v974_v40  ;;  %v978_v49 = vsub.f32 -inf, %v2568_v46  ;;  %v1830_v46 = vld [vmem:[#allocation14] sm:$0xff]  }
 0x38f   : > { %v1017_v51 = vmul.f32 1.442695, %v1002_v48  ;;  %636 = vst.msk [vmem:[#allocation3 + $0x18] sm:$0xff] %vm521_vm2, %v633_v50  ;;  %1846 = vpow2.f32 %v1015_v47  ;;  %1037 = vadd.xlane.f32.xlu0 %v1036_v52  ;;  %v977_v47 = vsub.f32 -inf, %v2564_v43  ;;  %v987_v48 = vmul.f32 1.442695, %v975_v44 }
 0x390   : > { %v628_v54 = vpop.permute.xlu0 %627  ;;  %1674 = vmatmul.mubr.msk.bf16.vlgmr.msra.gmra.mrb[20].mxu1 %vm521_vm2, %v1060_v53  ;;  %v989_v50 = vmul.f32 1.442695, %v976_v45  ;;  %v993_v30 = vmul.f32 1.442695, %v978_v49 }
 0x391   : > { %631 = vst.msk [vmem:[#allocation3 + $0x10] sm:$0xff] %vm521_vm2, %v628_v54  ;;  %v1843_v55 = vpop.eup %1842  ;;  %1848 = vpow2.f32 %v1017_v51  ;;  %1685 = vmatprep.mubr.msk.bf16.mxu1 %vm2124_vm0, %v2123_v0  ;;  %v991_v51 = vmul.f32 1.442695, %v977_v47 }
 0x392   : > { %v1039_v56 = vsel %vm521_vm2, %v1843_v55, 0.0  ;;  %1850 = vpow2.f32 %v979_v12 }
 0x393   : > { %v1845_v57 = vpop.eup %1844  ;;  %1040 = vadd.xlane.f32.xlu0 %v1039_v56  ;;  %1852 = vpow2.f32 %v981_v13  ;;  %v1831_v13 = vld [vmem:[#allocation14 + $0x8] sm:$0xff]  }
 0x394   : > { %v1042_v58 = vsel %vm521_vm2, %v1845_v57, 0.0  ;;  %v1061_v59 = vpack.c.bf16 %v1845_v57, %v1843_v55 }
 0x395   : > { %1043 = vadd.xlane.f32.xlu1 %v1042_v58 }
 0x396   : > { %v758_v60 = vld [vmem:[#allocation3 + $0x18] sm:$0xff] }
 0x397   : > { %1684 = vmatpush3.bf16.msra.mxu1 %v758_v60 }
 0x398   : > { %v757_v61 = vld [vmem:[#allocation3 + $0x10] sm:$0xff] }
 0x399   : > { %1678 = vmatpush3.bf16.msra.mxu0 %v757_v61  ;;  %v1847_v62 = vpop.eup %1846 }
 0x39a   : > { %1689 = vmatprep.subr.bf16.mxu0 %v2123_v0  ;;  %v1045_v63 = vsel %vm521_vm2, %v1847_v62, 0.0 }
 0x39b   : > { %v1849_v1 = vpop.eup %1848  ;;  %1046 = vadd.xlane.f32.xlu0 %v1045_v63 }
 0x39c   : > { %1680 = vmatmul.mubr.msk.bf16.vlgmr.msra.gmra.mrb[12].mxu0 %vm521_vm2, %v1061_v59  ;;  %v1048_v2 = vsel %vm521_vm2, %v1849_v1, 0.0  ;;  %v1062_v3 = vpack.c.bf16 %v1849_v1, %v1847_v62  ;;  %v1851_v18 = vpop.eup %1850 }
 0x39d   : > { %1697 = vmatprep.mubr.msk.bf16.mxu0 %vm2124_vm0, %v2123_v0  ;;  %1049 = vadd.xlane.f32.xlu1 %v1048_v2  ;;  %v1853_v20 = vpop.eup %1852  ;;  %v1019_v24 = vmul.f32 0.0, %v1851_v18 }
 0x39e   : > { %1686 = vmatmul.mubr.msk.bf16.vlgmr.msra.gmra.mrb[24].mxu1 %vm521_vm2, %v1062_v3  ;;  %v1020_v26 = vmul.f32 0.0, %v1853_v20  ;;  %1690 = vmatpush3.bf16.msra.mxu0 %v1830_v46 }
 0x39f   : > { %1028 = vadd.xlane.f32.xlu0 %v1027_v4  ;;  %1691 = vmatprep.subr.bf16.mxu0 %v2123_v0 }
 0x3a1   : > { %1031 = vadd.xlane.f32.xlu1 %v1030_v5 }
 0x3a2   : > { %1692 = vmatpush3.bf16.msra.mxu0 %v1831_v13 }
 0x3a3   : > { %1693 = vmatprep.subr.bf16.mxu0 %v2123_v0 }
 0x3ee   : > { %v1100_v6 = vpop.f32.mrb[8].mxu0 }
 0x3ef   : > { %v1669_v7 = vpop.f32.mrb[9].mxu0  ;;  %v1239_v29 = vadd.f32 %v1100_v6, %v1019_v24 }
 0x3f0   : > { %v1103_v8 = vpop.f32.mrb[10].mxu0 }
 0x3f1   : > { %v1670_v9 = vpop.f32.mrb[11].mxu0  ;;  %v1240_v31 = vadd.f32 %v1103_v8, %v1020_v26 }
 0x418   : > { %v1035_v15 = vpop.xlane.xlu1 %1034 }
 0x41c   : > { %v1038_v14 = vpop.xlane.xlu0 %1037 }
 0x420   : > { %v1041_v16 = vpop.xlane.xlu0 %1040 }
 0x422   : > { %v1044_v17 = vpop.xlane.xlu1 %1043 }
 0x428   : > { %v1047_v19 = vpop.xlane.xlu0 %1046 }
 0x42a   : > { %v2592_v22 = vpop.xlane.xlu1 %1049 }
 0x42c   : > { %v1029_v25 = vpop.xlane.xlu0 %1028 }
 0x42d   : > { %v1051_v27 = vadd.f32 %v1029_v25, %v1019_v24 }
 0x42e   : > { %v1032_v21 = vpop.xlane.xlu1 %1031 }
 0x42f   : > { %1854 = vrcp.f32 %v1051_v27  ;;  %v1052_v23 = vadd.f32 %v1032_v21, %v1020_v26 }
 0x431   : > { %1856 = vrcp.f32 %v1052_v23 }
 0x432   : > { %1858 = vpow2.f32 %v983_v41 }
 0x433   : > { %1860 = vpow2.f32 %v985_v42 }
 0x434   : > { %1862 = vpow2.f32 %v987_v48  ;;  %v1556_v48 = vld [vmem:[%s2705_s19] ss:$0 sm:$0xff] }
 0x435   : > { %1864 = vpow2.f32 %v989_v50 }
 0x436   : > { %1866 = vpow2.f32 %v991_v51 }
 0x437   : > { %1868 = vpow2.f32 %v993_v30 }
 0x439   : > { %v1855_v28 = vpop.eup %1854 }
 0x43a   : > { %v1255_v34 = vmul.f32 %v1855_v28, %v1239_v29 }
 0x43b   : > { %v1857_v32 = vpop.eup %1856 }
 0x43c   : > { %v1256_v35 = vmul.f32 %v1857_v32, %v1240_v31  ;;  %v1859_v52 = vpop.eup %1858 }
 0x43d   : > { %v1861_v53 = vpop.eup %1860  ;;  %v1021_v33 = vmul.f32 0.0, %v1859_v52 }
 0x43e   : > { %v1263_v37 = vpack.c.bf16 %v1256_v35, %v1255_v34  ;;  %v1022_v55 = vmul.f32 0.0, %v1861_v53  ;;  %v1863_v38 = vpop.eup %1862 }
 0x43f   : > { %v1053_v54 = vadd.f32 %v1035_v15, %v1021_v33  ;;  %v1865_v43 = vpop.eup %1864  ;;  %v1023_v57 = vmul.f32 0.0, %v1863_v38 }
 0x440   : > { %1264 = vst.msk [vmem:[#allocation5] sm:$0xff] %vm521_vm2, %v1263_v37  ;;  %v1054_v36 = vadd.f32 %v1038_v14, %v1022_v55  ;;  %v1867_v56 = vpop.eup %1866  ;;  %v1024_v60 = vmul.f32 0.0, %v1865_v43 }
 0x441   : > { %1870 = vrcp.f32 %v1053_v54  ;;  %v1869_v58 = vpop.eup %1868  ;;  %v1055_v59 = vadd.f32 %v1041_v16, %v1023_v57  ;;  %v1025_v61 = vmul.f32 0.0, %v1867_v56  ;;  %v1832_v16 = vld [vmem:[#allocation14 + $0x10] sm:$0xff]  }
 0x442   : > { %1872 = vrcp.f32 %v1054_v36  ;;  %v1056_v62 = vadd.f32 %v1044_v17, %v1024_v60  ;;  %v1026_v2 = vmul.f32 0.0, %v1869_v58  ;;  %1694 = vmatpush3.bf16.msra.mxu0 %v1832_v16 }
 0x443   : > { %v1057_v1 = vadd.f32 %v1047_v19, %v1025_v61  ;;  %1874 = vrcp.f32 %v1055_v59  ;;  %1695 = vmatprep.subr.bf16.mxu0 %v2123_v0 }
 0x444   : > { %v1058_v7 = vadd.f32 %v2592_v22, %v1026_v2  ;;  %1876 = vrcp.f32 %v1056_v62  ;;  %v1833_v22 = vld [vmem:[#allocation14 + $0x18] sm:$0xff]  }
 0x445   : > { %1878 = vrcp.f32 %v1057_v1 }
 0x446   : > { %1880 = vrcp.f32 %v1058_v7  ;;  %1696 = vmatpush3.bf16.msra.mxu0 %v1833_v22 }
 0x44b   : > { %v1871_v5 = vpop.eup %1870 }
 0x44c   : > { %v1873_v11 = vpop.eup %1872 }
 0x44d   : > { %v1875_v19 = vpop.eup %1874 }
 0x44e   : > { %v1877_v21 = vpop.eup %1876 }
 0x44f   : > { %v1879_v29 = vpop.eup %1878 }
 0x450   : > { %v1881_v39 = vpop.eup %1880 }
 0x463   : > { %v1144_v63 = vpop.f32.mrb[20].mxu1 }
 0x464   : > { %v1241_v3 = vadd.f32 %v1144_v63, %v1021_v33  ;;  %v1675_v4 = vpop.f32.mrb[21].mxu1 }
 0x465   : > { %v1147_v6 = vpop.f32.mrb[22].mxu1 }
 0x466   : > { %v1257_v8 = vmul.f32 %v1871_v5, %v1241_v3  ;;  %v1242_v9 = vadd.f32 %v1147_v6, %v1022_v55  ;;  %v1676_v10 = vpop.f32.mrb[23].mxu1 }
 0x468   : > { %v1258_v12 = vmul.f32 %v1873_v11, %v1242_v9 }
 0x46a   : > { %v1265_v14 = vpack.c.bf16 %v1258_v12, %v1257_v8 }
 0x46c   : > { %1267 = vrot.lane.b32.xlu0 %v1265_v14, %s2128_s18  ;;  %s2024_s18 = scalar_lea.vmem %s2611_s29, 256 }
 0x46d   : > { %p2025_p8 = scmp.ne.s32.totalorder %s2611_s29, %s2024_s18 }
 0x46f   : > { %v1188_v15 = vpop.f32.mrb[12].mxu0  ;;  %p2026_p6 = pnand %p2025_p8, %p2368_p5 }
 0x470   : > { %v1243_v17 = vadd.f32 %v1188_v15, %v1023_v57  ;;  %v1681_v18 = vpop.f32.mrb[13].mxu0 }
 0x471   : > { %v1191_v20 = vpop.f32.mrb[14].mxu0  ;;  %v1232_v26 = vpop.f32.mrb[24].mxu1  ;;  %p2027_p10 = pneg %p2026_p6 }
 0x472   : > { %v1259_v24 = vmul.f32 %v1875_v19, %v1243_v17  ;;  %v1244_v25 = vadd.f32 %v1191_v20, %v1024_v60  ;;  %v1682_v27 = vpop.f32.mrb[15].mxu0  ;;  %v1245_v23 = vadd.f32 %v1232_v26, %v1025_v61  ;;  %v1687_v28 = vpop.f32.mrb[25].mxu1 }
 0x473   : > { %v1235_v32 = vpop.f32.mrb[26].mxu1 }
 0x474   : > { %v1260_v31 = vmul.f32 %v1877_v21, %v1244_v25  ;;  %v1261_v34 = vmul.f32 %v1879_v29, %v1245_v23  ;;  %v1246_v35 = vadd.f32 %v1235_v32, %v1026_v2  ;;  %v1688_v37 = vpop.f32.mrb[27].mxu1 }
 0x476   : > { %v1272_v40 = vpack.c.bf16 %v1260_v31, %v1259_v24  ;;  %v1262_v41 = vmul.f32 %v1881_v39, %v1246_v35 }
 0x478   : > { %1274 = vrot.lane.b32.xlu1 %v1272_v40, %s2129_s12  ;;  %v1279_v42 = vpack.c.bf16 %v1262_v41, %v1261_v34  ;;  %s2131_s12 = smov [#allocation15]  }
 0x47c   : > { %1281 = vrot.lane.b32.xlu1 %v1279_v42, %s2130_s9  ;;  %s2028_s9 = sshll.u32 %s2131_s12, 4  ;;  %s2029_s9 = int_to_ptr.vmem [resolvable:$false] %s2028_s9 }
 0x47d   : > { %s2030_s22 = scalar_lea.vmem %s2029_s9, 512  ;;  %p2031_p3 = scmp.lt.s32.totalorder %s2611_s29, %s2029_s9 }
 0x47e   : > { %p2032_p7 = scmp.lt.s32.totalorder %s2030_s22, %s2024_s18 }
 0x480   : > { %p2033_p9 = por %p2032_p7, %p2031_p3 }
 0x482   : > { %p2034_p0 = pnand %p2033_p9, %p2027_p10 }
 0x4de   : > { %v1268_v0 = vpop.permute.xlu0 %1267 }
 0x4df   : > { %1271 = vst.msk [vmem:[#allocation5] sm:$0xff] %vm1270_vm3, %v1268_v0 }
 0x4ea   : > { %v1275_v44 = vpop.permute.xlu1 %1274 }
 0x4eb   : > { %1278 = vst.msk [vmem:[#allocation5] sm:$0xff] %vm1277_vm4, %v1275_v44 }
 0x4ee   : > { %v1282_v45 = vpop.permute.xlu1 %1281 }
 0x4ef   : > { %1285 = vst.msk [vmem:[#allocation5] sm:$0xff] %vm1284_vm5, %v1282_v45 }
 0x4f6   : > { %v1286_v47 = vld [vmem:[#allocation5] sm:$0xff] }
 0x4f7   : > { %1698 = vmatmul.mubr.msk.bf16.vlgmr.msra.gmra.mrb[16].mxu0 %vm475_vm1, %v1286_v47 }
 0x5ca   : > { %v1363_v49 = vpop.f32.mrb[16].mxu0 }
 0x5cb   : > { %v1364_v50 = vadd.f32 %v1556_v48, %v1363_v49  ;;  %v1699_v51 = vpop.f32.mrb[17].mxu0 }
 0x5cc   : > { %v1366_v52 = vpop.f32.mrb[18].mxu0 }
 0x5cd   : > { %1370 = vst.msk [vmem:[%s422_s21] sm:$0xff] %vm475_vm1, %v1364_v50  ;;  %v1367_v30 = vadd.f32 %v1556_v48, %v1366_v52  ;;  %v1700_v53 = vpop.f32.mrb[19].mxu0 }
 0x5cf   : > { %1371 = vst.msk [vmem:[%s422_s21 + $0x8] sm:$0xff] %vm475_vm1, %v1367_v30 }
 0x5d0   : > { %2037 = shalt.err (!%p2034_p0)
}
 0x5d1   : > { %s2038_s27 = scalar_lea.hbm %s2616_s6, 256  ;;  %s2042_s19 = scalar_lea.hbm %s2706_s26, 512 }
 0x5d2   : > { %p2039_p4 = scmp.ne.s32.totalorder %s2616_s6, %s2038_s27  ;;  %p2043_p12 = scmp.lt.u32.totalorder %s2616_s6, %s2706_s26 }
 0x5d3   : > { %p2044_p1 = scmp.lt.u32.totalorder %s2042_s19, %s2038_s27  ;;  %p2046_p8 = scmp.lt.u32.totalorder %s2038_s27, %s2616_s6 }
 0x5d4   : > { %p2040_p13 = pnand %p2039_p4, %p2368_p5 }
 0x5d5   : > { %p2045_p11 = por %p2044_p1, %p2043_p12 }
 0x5d6   : > { %p2041_p2 = pneg %p2040_p13 }
 0x5d7   : > { %p2047_p6 = por %p2046_p8, %p2045_p11 }
 0x5d9   : > { %p2048_p10 = pnand %p2047_p6, %p2041_p2 }
 0x5db   : > { %2051 = shalt.err (!%p2048_p10)
}
 0x5dc   : > { %s2132_s23 = smov 128   ;;  %s2133_s28 = smov 8  }
 0x5dd   : > { %1719 = dma.vmem_to_hbm [thread:$0]  (%p2368_p5), %s2611_s29, 256, %s2616_s6, %s1373_s16, %s2132_s23, %s2132_s23, %s2133_s28  }
 0x5de PF: > { %s2707_s18 = sld [smem:[#allocation20_spill]]  ;;  %s2708_s12 = sld [smem:[#allocation22_spill]] }
 0x5df   : > { %p2710_p7 = scmp.ge.s32.totalorder %s2114_s14, 2 }
 0x5e4   : > { %s1403_s9 = sand.u32 1, %s2707_s18   ;;  %p2709_p3 = scmp.ne.s32.totalorder %s2708_s12, 0 }
 0x5e5   : > { %s1404_s22 = scalar_lea.sflag [#allocation8], %s1403_s9 }
 0x5e6   : > { %p1739_p9 = pnand %p2710_p7, %p2709_p3 }
 0x5e8   : > { %2089 = dma.done.wait (!%p1739_p9), %s1404_s22, 256  }
 0x5e9   : > { %2091 = vsyncadd (!%p1739_p9), %s1404_s22, 4294967040  ;;  %s27_s14 = sadd.s32 1, %s2114_s14   ;;  %s2711_s8 = smov %s2718_s30 }
 0x5ea   : > { %p24_p0 = scmp.ge.s32.totalorder %s27_s14, 4   ;;  %s2712_s30 = smov %s2098_s10 }
 0x5eb   : > { %s2713_s10 = smov %s2102_s11  ;;  %s2714_s11 = smov %s2377_s25 }
 0x5ec   : > { %s2715_s12 = smov %s2110_s13  ;;  %s2716_s13 = smov %s2711_s8 }
 0x5ed   :  { %26 = sbr.rel (!%p24_p0) target bundleno = 12 (0xc), region = 130 }
 0x5f4   :  { %1409 = vsyncpa [#allocation7], 1 }
 0x5f5   :  { %1411 = vsyncpa [#allocation7 + $0x1], 1 }
 0x5f6   :  { %1412 = vsyncpa [#allocation10], 1 }
 0x5f7   :  { %1413 = vsyncpa [#allocation13], 1 }
 0x5f8   :  { %1414 = vsyncpa [#allocation8], 1 }
 0x5f9   :  { %1416 = vsyncpa [#allocation8 + $0x1], 1 }

</bundles_post_ra>
